<compile_context>
chip_gen: v6e
topology: v6e:2x2x1
jax: 0.10.0
libtpu: 0.0.40
codegen_flags: <defaults>
</compile_context>

<pallas_src>
import functools

import jax
import jax.numpy as jnp
from jax.experimental import pallas as pl
from jax.experimental.pallas import tpu as pltpu


def _round_up(x, m):
    return (x + m - 1) // m * m


def _recommender_kernel(
    widx_ref,   # (T*Bt, K) int32  windowed text ids, pre-shifted by k*V, (t,b)-major
    wtext_ref,  # (K*V, F)         emb_text folded into conv weights
    bconv_ref,  # (1, F)    f32
    xside_ref,  # (Bt, Dside)      [loc | item_season | onehot(cat) | query_season]
    wside_ref,  # (Dside, 4*DU)    block-diagonal fused side weights (emb_cat folded)
    bside_ref,  # (1, 4*DU) f32
    w1_ref,     # (F + 4*DU, S)
    b1_ref,     # (1, S)    f32
    w2_ref,     # (S, S//2)
    b2_ref,     # (1, S//2) f32
    wo_ref,     # (1, S//2) f32    output head as a row (VPU reduction)
    bo_ref,     # (1, 1)    f32
    out_ref,    # (Bt, 1)   f32
):
    f32 = jnp.float32
    RT, K = widx_ref.shape
    KV, F = wtext_ref.shape
    Bt = out_ref.shape[0]
    T = RT // Bt
    cdt = wtext_ref.dtype                     # bf16 (default) or f32

    # ---- Text branch: embedding gather + Conv1d fused into ONE matmul.
    # Row r = (t, b): multi-hot over K*V columns at {text[b,t+k] + k*V} selects
    # and sums the K folded weight rows == conv output at time t.
    ids = widx_ref[...]                                           # (T*Bt, K)
    col = jax.lax.broadcasted_iota(jnp.int32, (RT, KV), 1)
    hit = col == ids[:, 0:1]
    for k in range(1, K):                                         # K static -> unrolled
        hit = jnp.logical_or(hit, col == ids[:, k:k + 1])
    multihot = hit.astype(cdt)                                    # exact 0/1
    conv = jnp.dot(multihot, wtext_ref[...], preferred_element_type=f32)
    conv = jnp.maximum(conv + bconv_ref[...], 0.0)                # (T*Bt, F)
    # Rows are (t, b)-major and Bt % 8 == 0 -> tile-aligned reshape; the
    # max-over-time is an elementwise max of T slabs (pure VPU).
    x_text = jnp.max(conv.reshape(T, Bt, F), axis=0)              # (Bt, F)

    # ---- Four side dense+ReLU branches fused into ONE matmul.
    x_side = jnp.maximum(
        jnp.dot(xside_ref[...], wside_ref[...], preferred_element_type=f32)
        + bside_ref[...], 0.0)                                    # (Bt, 4*DU)

    # ---- fc1 over the concat (F + 4*DU = 96 lanes -> one vreg block, one matmul).
    combined = jnp.concatenate([x_text.astype(cdt), x_side.astype(cdt)], axis=-1)
    h1 = jnp.maximum(
        jnp.dot(combined, w1_ref[...], preferred_element_type=f32) + b1_ref[...],
        0.0)
    # dropout1: identity (inference)
    h2 = jnp.maximum(
        jnp.dot(h1.astype(cdt), w2_ref[...], preferred_element_type=f32)
        + b2_ref[...], 0.0)
    # dropout2: identity (inference)

    # ---- Output head: (S//2 -> 1) as VPU multiply + lane reduce (no MXU pass).
    out_ref[...] = jnp.sum(h2 * wo_ref[...], axis=-1, keepdims=True) + bo_ref[...]


@functools.partial(jax.jit, static_argnames=("block_batch", "compute_dtype"))
def recommender_forward(params, text, location, item_season, category,
                        query_season, *, block_batch=512,
                        compute_dtype=jnp.bfloat16):
    f32 = jnp.float32
    emb_text = params["emb_text"].astype(f32)          # (V, E); row 0 is zero (padding_idx=0)
    w_conv = params["w_conv"].astype(f32)              # (K, E, F)
    V, _ = emb_text.shape
    K, _, F = w_conv.shape
    B, L = text.shape
    T = L - K + 1
    DU = params["w_loc"].shape[1]
    ncat = params["emb_cat"].shape[0]

    # Fold the text embedding table into the conv weights: (K*V, F).
    w_text = jnp.einsum("ve,kef->kvf", emb_text, w_conv).reshape(K * V, F)

    # Fuse the 4 side branches into one block-diagonal weight (emb_cat folded in).
    d_loc = params["w_loc"].shape[0]
    d_is = params["w_is"].shape[0]
    d_qs = params["w_qs"].shape[0]
    dside = d_loc + d_is + ncat + d_qs
    w_cat_eff = params["emb_cat"].astype(f32) @ params["w_cat"].astype(f32)
    w_side = jnp.zeros((dside, 4 * DU), f32)
    r = 0
    w_side = w_side.at[r:r + d_loc, 0 * DU:1 * DU].set(params["w_loc"].astype(f32)); r += d_loc
    w_side = w_side.at[r:r + d_is, 1 * DU:2 * DU].set(params["w_is"].astype(f32)); r += d_is
    w_side = w_side.at[r:r + ncat, 2 * DU:3 * DU].set(w_cat_eff); r += ncat
    w_side = w_side.at[r:r + d_qs, 3 * DU:4 * DU].set(params["w_qs"].astype(f32))
    b_side = jnp.concatenate(
        [params["b_loc"], params["b_is"], params["b_cat"], params["b_qs"]],
        axis=1).astype(f32)

    # Side feature row: [loc | item_season | onehot(cat) | query_season].
    cat_oh = jax.nn.one_hot(category, ncat, dtype=f32)
    x_side = jnp.concatenate(
        [location.astype(f32), item_season.astype(f32), cat_oh,
         query_season.astype(f32)], axis=1)                       # (B, dside)

    # ---- Batch tiling: Bt multiple of 8, grid over batch (parallel on v7x).
    bt = _round_up(min(block_batch, _round_up(B, 8)), 8)
    b_pad = _round_up(B, bt)
    ntiles = b_pad // bt
    pad = b_pad - B

    text_p = jnp.pad(text.astype(jnp.int32), ((0, pad), (0, 0)))  # pad id 0 -> zero emb
    x_side_p = jnp.pad(x_side, ((0, pad), (0, 0)))

    # Windowed, k*V-shifted ids in (tile, t, b) order so the in-kernel reshape
    # (T*Bt, F) -> (T, Bt, F) is tile aligned.
    offs = jnp.arange(K, dtype=jnp.int32) * V
    win = jnp.stack([text_p[:, k:k + T] for k in range(K)], axis=-1) + offs  # (b_pad, T, K)
    widx = (win.reshape(ntiles, bt, T, K)
               .transpose(0, 2, 1, 3)
               .reshape(ntiles * T * bt, K))

    cdt = compute_dtype
    args = (
        widx,
        w_text.astype(cdt), params["b_conv"].astype(f32),
        x_side_p.astype(cdt), w_side.astype(cdt), b_side,
        params["w1"].astype(cdt), params["b1"].astype(f32),
        params["w2"].astype(cdt), params["b2"].astype(f32),
        params["wo"].astype(f32).reshape(1, -1),
        params["bo"].astype(f32).reshape(1, 1),
    )

    def _tiled(block):
        return pl.BlockSpec(block, lambda i: (i, 0))

    def _resident(a):                     # weights/biases stay VMEM-resident
        return pl.BlockSpec(a.shape, lambda i: (0, 0))

    in_specs = [
        _tiled((T * bt, K)),              # widx
        _resident(args[1]), _resident(args[2]),
        _tiled((bt, dside)),              # x_side
        _resident(args[4]), _resident(args[5]),
        _resident(args[6]), _resident(args[7]),
        _resident(args[8]), _resident(args[9]),
        _resident(args[10]), _resident(args[11]),
    ]

    out = pl.pallas_call(
        _recommender_kernel,
        out_shape=jax.ShapeDtypeStruct((b_pad, 1), f32),
        grid=(ntiles,),
        in_specs=in_specs,
        out_specs=pl.BlockSpec((bt, 1), lambda i: (i, 0)),
        compiler_params=pltpu.CompilerParams(
            dimension_semantics=("parallel",),       # use both TCs on v7x
            vmem_limit_bytes=32 * 1024 * 1024,       # budget vs v7x 64 MiB physical
        ),
    )(*args)
    return out[:B]


def _reference_forward(params, text, location, item_season, category,
                       query_season):
    """Pure-JAX replica of the PyTorch forward (eval mode), for checking."""
    relu = jax.nn.relu
    xt = params["emb_text"][text]                         # (B, L, E)
    K, _, _ = params["w_conv"].shape
    T = text.shape[1] - K + 1
    conv = sum(jnp.einsum("ble,ef->blf", xt[:, k:k + T, :], params["w_conv"][k])
               for k in range(K)) + params["b_conv"][None]
    x_text = jnp.max(relu(conv), axis=1)
    dense = lambda x, w, b: relu(x @ w + b)
    x_loc = dense(location, params["w_loc"], params["b_loc"])
    x_is = dense(item_season, params["w_is"], params["b_is"])
    x_cat = dense(params["emb_cat"][category], params["w_cat"], params["b_cat"])
    x_qs = dense(query_season, params["w_qs"], params["b_qs"])
    comb = jnp.concatenate([x_text, x_loc, x_is, x_cat, x_qs], axis=1)
    h1 = relu(comb @ params["w1"] + params["b1"])
    h2 = relu(h1 @ params["w2"] + params["b2"])
    return h2 @ params["wo"] + params["bo"]


def init_params(key,
                vocab_size=50, text_embedding_dim=16,
                location_input_dim=2, item_season_input_dim=4,
                query_season_input_dim=4, num_categories=10,
                category_embedding_dim=8, conv_filters=32, kernel_size=3,
                dense_units=16, shared_dense_units=32):
    ks = jax.random.split(key, 16)
    w = lambda k, shape, s=0.1: jax.random.normal(k, shape, jnp.float32) * s

    emb_text = w(ks[0], (vocab_size, text_embedding_dim))
    emb_text = emb_text.at[0].set(0.0)  # padding_idx=0

    combined = conv_filters + 4 * dense_units
    return dict(
        emb_text=emb_text,
        emb_cat=w(ks[1], (num_categories, category_embedding_dim)),
        # (K, E, F) == torch Conv1d weight (F, E, K) transposed by (2, 1, 0)
        w_conv=w(ks[2], (kernel_size, text_embedding_dim, conv_filters)),
        b_conv=w(ks[3], (1, conv_filters)),
        w_loc=w(ks[4], (location_input_dim, dense_units)),
        b_loc=w(ks[5], (1, dense_units)),
        w_is=w(ks[6], (item_season_input_dim, dense_units)),
        b_is=w(ks[7], (1, dense_units)),
        w_cat=w(ks[8], (category_embedding_dim, dense_units)),
        b_cat=w(ks[9], (1, dense_units)),
        w_qs=w(ks[10], (query_season_input_dim, dense_units)),
        b_qs=w(ks[11], (1, dense_units)),
        w1=w(ks[12], (combined, shared_dense_units)),
        b1=w(ks[13], (1, shared_dense_units)),
        w2=w(ks[14], (shared_dense_units, shared_dense_units // 2)),
        b2=jnp.zeros((1, shared_dense_units // 2), jnp.float32),
        wo=w(ks[15], (shared_dense_units // 2, 1)),
        bo=jnp.zeros((1, 1), jnp.float32),
    )


if __name__ == "__main__":
    jax.config.update("jax_default_matmul_precision", "highest")

    key = jax.random.PRNGKey(0)
    pkey, dkey = jax.random.split(key)
    params = init_params(pkey)

    B, L = 2, 8
    dks = jax.random.split(dkey, 5)
    text = jax.random.randint(dks[0], (B, L), 0, 50, dtype=jnp.int32)
    location = jax.random.normal(dks[1], (B, 2), jnp.float32)
    item_season = jax.random.normal(dks[2], (B, 4), jnp.float32)
    category = jax.random.randint(dks[3], (B,), 0, 10, dtype=jnp.int32)
    query_season = jax.random.normal(dks[4], (B, 4), jnp.float32)

    # Exact-parity path (f32 operands) validated against the pure-JAX reference.
    out_f32 = recommender_forward(params, text, location, item_season, category,
                                  query_season, compute_dtype=jnp.float32)
    ref = _reference_forward(params, text, location, item_season, category,
                             query_season)
    jax.block_until_ready((out_f32, ref))
    assert out_f32.shape == (B, 1) and out_f32.dtype == jnp.float32
    assert jnp.allclose(out_f32, ref, atol=1e-2, rtol=1e-2), (out_f32, ref)

    # Default serving path: bf16 matmul operands, f32 accumulate.
    out = recommender_forward(params, text, location, item_season, category,
                              query_season)
    jax.block_until_ready(out)
    assert out.shape == (B, 1) and out.dtype == jnp.float32
    print("KERNEL_OK")
</pallas_src>

<mosaic_0001>
module attributes {stable_mosaic.version = 11 : i64} {
  func.func @_recommender_kernel(%arg0: i32, %arg1: memref<48x3xi32, #tpu.memory_space<vmem>>, %arg2: memref<150x32xf32, #tpu.memory_space<vmem>>, %arg3: memref<1x32xf32, #tpu.memory_space<vmem>>, %arg4: memref<8x20xf32, #tpu.memory_space<vmem>>, %arg5: memref<20x64xf32, #tpu.memory_space<vmem>>, %arg6: memref<1x64xf32, #tpu.memory_space<vmem>>, %arg7: memref<96x32xf32, #tpu.memory_space<vmem>>, %arg8: memref<1x32xf32, #tpu.memory_space<vmem>>, %arg9: memref<32x16xf32, #tpu.memory_space<vmem>>, %arg10: memref<1x16xf32, #tpu.memory_space<vmem>>, %arg11: memref<1x16xf32, #tpu.memory_space<vmem>>, %arg12: memref<1x1xf32, #tpu.memory_space<vmem>>, %arg13: memref<8x1xf32, #tpu.memory_space<vmem>>) attributes {dimension_semantics = [#tpu.dimension_semantics<parallel>], iteration_bounds = array<i64: 1>, scalar_prefetch = 0 : i64, scratch_operands = 0 : i64, tpu.core_type = #tpu.core_type<tc>, window_params = [{transform_indices = @transform_0, window_bounds = array<i64: 48, 3>}, {pipeline_mode = #tpu.pipeline_mode<synchronous>, transform_indices = @transform_1, window_bounds = array<i64: 150, 32>}, {pipeline_mode = #tpu.pipeline_mode<synchronous>, transform_indices = @transform_2, window_bounds = array<i64: 1, 32>}, {transform_indices = @transform_3, window_bounds = array<i64: 8, 20>}, {pipeline_mode = #tpu.pipeline_mode<synchronous>, transform_indices = @transform_4, window_bounds = array<i64: 20, 64>}, {pipeline_mode = #tpu.pipeline_mode<synchronous>, transform_indices = @transform_5, window_bounds = array<i64: 1, 64>}, {pipeline_mode = #tpu.pipeline_mode<synchronous>, transform_indices = @transform_6, window_bounds = array<i64: 96, 32>}, {pipeline_mode = #tpu.pipeline_mode<synchronous>, transform_indices = @transform_7, window_bounds = array<i64: 1, 32>}, {pipeline_mode = #tpu.pipeline_mode<synchronous>, transform_indices = @transform_8, window_bounds = array<i64: 32, 16>}, {pipeline_mode = #tpu.pipeline_mode<synchronous>, transform_indices = @transform_9, window_bounds = array<i64: 1, 16>}, {pipeline_mode = #tpu.pipeline_mode<synchronous>, transform_indices = @transform_10, window_bounds = array<i64: 1, 16>}, {pipeline_mode = #tpu.pipeline_mode<synchronous>, transform_indices = @transform_11, window_bounds = array<i64: 1, 1>}, {transform_indices = @transform_12, window_bounds = array<i64: 8, 1>}]} {
    %c0 = arith.constant 0 : index
    %c0_0 = arith.constant 0 : index
    %0 = vector.load %arg1[%c0, %c0_0] : memref<48x3xi32, #tpu.memory_space<vmem>>, vector<48x3xi32>
    %1 = tpu.iota {dimensions = array<i32: 1>} : vector<48x150xi32>
    %2 = vector.extract_strided_slice %0 {offsets = [0, 0], sizes = [48, 1], strides = [1, 1]} : vector<48x3xi32> to vector<48x1xi32>
    %3 = vector.broadcast %2 : vector<48x1xi32> to vector<48x150xi32>
    %4 = arith.cmpi eq, %1, %3 : vector<48x150xi32>
    %5 = vector.extract_strided_slice %0 {offsets = [0, 1], sizes = [48, 1], strides = [1, 1]} : vector<48x3xi32> to vector<48x1xi32>
    %6 = vector.broadcast %5 : vector<48x1xi32> to vector<48x150xi32>
    %7 = arith.cmpi eq, %1, %6 : vector<48x150xi32>
    %8 = arith.ori %4, %7 : vector<48x150xi1>
    %9 = vector.extract_strided_slice %0 {offsets = [0, 2], sizes = [48, 1], strides = [1, 1]} : vector<48x3xi32> to vector<48x1xi32>
    %10 = vector.broadcast %9 : vector<48x1xi32> to vector<48x150xi32>
    %11 = arith.cmpi eq, %1, %10 : vector<48x150xi32>
    %12 = arith.ori %8, %11 : vector<48x150xi1>
    %13 = arith.extui %12 : vector<48x150xi1> to vector<48x150xi32>
    %14 = arith.sitofp %13 : vector<48x150xi32> to vector<48x150xf32>
    %c0_1 = arith.constant 0 : index
    %c0_2 = arith.constant 0 : index
    %15 = vector.load %arg2[%c0_1, %c0_2] : memref<150x32xf32, #tpu.memory_space<vmem>>, vector<150x32xf32>
    %cst = arith.constant dense<0.000000e+00> : vector<48x32xf32>
    %16 = tpu.matmul %14, %15, %cst {dimension_numbers = #tpu.dot_dimension_numbers<[1], [0], [0], [1], [0, 0, 1, 1], [], []>, precision = #tpu.contract_precision<fp32>} : vector<48x150xf32>, vector<150x32xf32>, vector<48x32xf32> -> vector<48x32xf32>
    %c0_3 = arith.constant 0 : index
    %c0_4 = arith.constant 0 : index
    %17 = vector.load %arg3[%c0_3, %c0_4] : memref<1x32xf32, #tpu.memory_space<vmem>>, vector<1x32xf32>
    %18 = vector.broadcast %17 : vector<1x32xf32> to vector<48x32xf32>
    %19 = arith.addf %16, %18 : vector<48x32xf32>
    %cst_5 = arith.constant 0.000000e+00 : f32
    %20 = vector.broadcast %cst_5 : f32 to vector<48x32xf32>
    %21 = arith.maximumf %19, %20 : vector<48x32xf32>
    %22 = vector.shape_cast %21 : vector<48x32xf32> to vector<6x8x32xf32>
    %cst_6 = arith.constant dense<0xFF800000> : vector<8x32xf32>
    %23 = vector.multi_reduction <maximumf>, %22, %cst_6 [0] : vector<6x8x32xf32> to vector<8x32xf32>
    %c0_7 = arith.constant 0 : index
    %c0_8 = arith.constant 0 : index
    %24 = vector.load %arg4[%c0_7, %c0_8] : memref<8x20xf32, #tpu.memory_space<vmem>>, vector<8x20xf32>
    %c0_9 = arith.constant 0 : index
    %c0_10 = arith.constant 0 : index
    %25 = vector.load %arg5[%c0_9, %c0_10] : memref<20x64xf32, #tpu.memory_space<vmem>>, vector<20x64xf32>
    %cst_11 = arith.constant dense<0.000000e+00> : vector<8x64xf32>
    %26 = tpu.matmul %24, %25, %cst_11 {dimension_numbers = #tpu.dot_dimension_numbers<[1], [0], [0], [1], [0, 0, 1, 1], [], []>, precision = #tpu.contract_precision<fp32>} : vector<8x20xf32>, vector<20x64xf32>, vector<8x64xf32> -> vector<8x64xf32>
    %c0_12 = arith.constant 0 : index
    %c0_13 = arith.constant 0 : index
    %27 = vector.load %arg6[%c0_12, %c0_13] : memref<1x64xf32, #tpu.memory_space<vmem>>, vector<1x64xf32>
    %28 = vector.broadcast %27 : vector<1x64xf32> to vector<8x64xf32>
    %29 = arith.addf %26, %28 : vector<8x64xf32>
    %cst_14 = arith.constant 0.000000e+00 : f32
    %30 = vector.broadcast %cst_14 : f32 to vector<8x64xf32>
    %31 = arith.maximumf %29, %30 : vector<8x64xf32>
    %32 = tpu.concatenate %23, %31 in 1 : vector<8x32xf32>, vector<8x64xf32> -> vector<8x96xf32>
    %c0_15 = arith.constant 0 : index
    %c0_16 = arith.constant 0 : index
    %33 = vector.load %arg7[%c0_15, %c0_16] : memref<96x32xf32, #tpu.memory_space<vmem>>, vector<96x32xf32>
    %cst_17 = arith.constant dense<0.000000e+00> : vector<8x32xf32>
    %34 = tpu.matmul %32, %33, %cst_17 {dimension_numbers = #tpu.dot_dimension_numbers<[1], [0], [0], [1], [0, 0, 1, 1], [], []>, precision = #tpu.contract_precision<fp32>} : vector<8x96xf32>, vector<96x32xf32>, vector<8x32xf32> -> vector<8x32xf32>
    %c0_18 = arith.constant 0 : index
    %c0_19 = arith.constant 0 : index
    %35 = vector.load %arg8[%c0_18, %c0_19] : memref<1x32xf32, #tpu.memory_space<vmem>>, vector<1x32xf32>
    %36 = vector.broadcast %35 : vector<1x32xf32> to vector<8x32xf32>
    %37 = arith.addf %34, %36 : vector<8x32xf32>
    %cst_20 = arith.constant 0.000000e+00 : f32
    %38 = vector.broadcast %cst_20 : f32 to vector<8x32xf32>
    %39 = arith.maximumf %37, %38 : vector<8x32xf32>
    %c0_21 = arith.constant 0 : index
    %c0_22 = arith.constant 0 : index
    %40 = vector.load %arg9[%c0_21, %c0_22] : memref<32x16xf32, #tpu.memory_space<vmem>>, vector<32x16xf32>
    %cst_23 = arith.constant dense<0.000000e+00> : vector<8x16xf32>
    %41 = tpu.matmul %39, %40, %cst_23 {dimension_numbers = #tpu.dot_dimension_numbers<[1], [0], [0], [1], [0, 0, 1, 1], [], []>, precision = #tpu.contract_precision<fp32>} : vector<8x32xf32>, vector<32x16xf32>, vector<8x16xf32> -> vector<8x16xf32>
    %c0_24 = arith.constant 0 : index
    %c0_25 = arith.constant 0 : index
    %42 = vector.load %arg10[%c0_24, %c0_25] : memref<1x16xf32, #tpu.memory_space<vmem>>, vector<1x16xf32>
    %43 = vector.broadcast %42 : vector<1x16xf32> to vector<8x16xf32>
    %44 = arith.addf %41, %43 : vector<8x16xf32>
    %cst_26 = arith.constant 0.000000e+00 : f32
    %45 = vector.broadcast %cst_26 : f32 to vector<8x16xf32>
    %46 = arith.maximumf %44, %45 : vector<8x16xf32>
    %c0_27 = arith.constant 0 : index
    %c0_28 = arith.constant 0 : index
    %47 = vector.load %arg11[%c0_27, %c0_28] : memref<1x16xf32, #tpu.memory_space<vmem>>, vector<1x16xf32>
    %48 = vector.broadcast %47 : vector<1x16xf32> to vector<8x16xf32>
    %49 = arith.mulf %46, %48 : vector<8x16xf32>
    %cst_29 = arith.constant dense<0.000000e+00> : vector<8xf32>
    %50 = vector.multi_reduction <add>, %49, %cst_29 [1] : vector<8x16xf32> to vector<8xf32>
    %51 = vector.shape_cast %50 : vector<8xf32> to vector<8x1xf32>
    %c0_30 = arith.constant 0 : index
    %c0_31 = arith.constant 0 : index
    %52 = vector.load %arg12[%c0_30, %c0_31] : memref<1x1xf32, #tpu.memory_space<vmem>>, vector<1x1xf32>
    %53 = vector.broadcast %52 : vector<1x1xf32> to vector<8x1xf32>
    %54 = arith.addf %51, %53 : vector<8x1xf32>
    %c0_32 = arith.constant 0 : index
    %c0_33 = arith.constant 0 : index
    %55 = vector.load %arg13[%c0_32, %c0_33] : memref<8x1xf32, #tpu.memory_space<vmem>>, vector<8x1xf32>
    tpu.vector_store %arg13[%c0_32, %c0_33], %54 {strides = array<i32>} : memref<8x1xf32, #tpu.memory_space<vmem>>, vector<8x1xf32>,
    return
  }
  func.func @transform_0(%arg0: i32) -> (i32, i32) {
    %c0_i32 = arith.constant 0 : i32
    %c0_i32_0 = arith.constant 0 : i32
    return %arg0, %c0_i32 : i32, i32
  }
  func.func @transform_1(%arg0: i32) -> (i32, i32) {
    %c0_i32 = arith.constant 0 : i32
    %c0_i32_0 = arith.constant 0 : i32
    %c0_i32_1 = arith.constant 0 : i32
    return %c0_i32, %c0_i32_0 : i32, i32
  }
  func.func @transform_2(%arg0: i32) -> (i32, i32) {
    %c0_i32 = arith.constant 0 : i32
    %c0_i32_0 = arith.constant 0 : i32
    %c0_i32_1 = arith.constant 0 : i32
    return %c0_i32, %c0_i32_0 : i32, i32
  }
  func.func @transform_3(%arg0: i32) -> (i32, i32) {
    %c0_i32 = arith.constant 0 : i32
    %c0_i32_0 = arith.constant 0 : i32
    return %arg0, %c0_i32 : i32, i32
  }
  func.func @transform_4(%arg0: i32) -> (i32, i32) {
    %c0_i32 = arith.constant 0 : i32
    %c0_i32_0 = arith.constant 0 : i32
    %c0_i32_1 = arith.constant 0 : i32
    return %c0_i32, %c0_i32_0 : i32, i32
  }
  func.func @transform_5(%arg0: i32) -> (i32, i32) {
    %c0_i32 = arith.constant 0 : i32
    %c0_i32_0 = arith.constant 0 : i32
    %c0_i32_1 = arith.constant 0 : i32
    return %c0_i32, %c0_i32_0 : i32, i32
  }
  func.func @transform_6(%arg0: i32) -> (i32, i32) {
    %c0_i32 = arith.constant 0 : i32
    %c0_i32_0 = arith.constant 0 : i32
    %c0_i32_1 = arith.constant 0 : i32
    return %c0_i32, %c0_i32_0 : i32, i32
  }
  func.func @transform_7(%arg0: i32) -> (i32, i32) {
    %c0_i32 = arith.constant 0 : i32
    %c0_i32_0 = arith.constant 0 : i32
    %c0_i32_1 = arith.constant 0 : i32
    return %c0_i32, %c0_i32_0 : i32, i32
  }
  func.func @transform_8(%arg0: i32) -> (i32, i32) {
    %c0_i32 = arith.constant 0 : i32
    %c0_i32_0 = arith.constant 0 : i32
    %c0_i32_1 = arith.constant 0 : i32
    return %c0_i32, %c0_i32_0 : i32, i32
  }
  func.func @transform_9(%arg0: i32) -> (i32, i32) {
    %c0_i32 = arith.constant 0 : i32
    %c0_i32_0 = arith.constant 0 : i32
    %c0_i32_1 = arith.constant 0 : i32
    return %c0_i32, %c0_i32_0 : i32, i32
  }
  func.func @transform_10(%arg0: i32) -> (i32, i32) {
    %c0_i32 = arith.constant 0 : i32
    %c0_i32_0 = arith.constant 0 : i32
    %c0_i32_1 = arith.constant 0 : i32
    return %c0_i32, %c0_i32_0 : i32, i32
  }
  func.func @transform_11(%arg0: i32) -> (i32, i32) {
    %c0_i32 = arith.constant 0 : i32
    %c0_i32_0 = arith.constant 0 : i32
    %c0_i32_1 = arith.constant 0 : i32
    return %c0_i32, %c0_i32_0 : i32, i32
  }
  func.func @transform_12(%arg0: i32) -> (i32, i32) {
    %c0_i32 = arith.constant 0 : i32
    %c0_i32_0 = arith.constant 0 : i32
    return %arg0, %c0_i32 : i32, i32
  }
}

</mosaic_0001>

<bundles_post_ra>
// kernel: recommender_forward.1
= control target key start
LH: loop header
LB: loop body
LE: loop exit
PB: predicated region body
PF: predicated region fallthrough
CT: control target
= control target key end

     0   :  { %v3358_v0 = vmov 2   ;;  %v3359_v1 = vmov 0   ;;  %v3360_v4 = vmov 0.0   ;;  %v3361_v18 = vmov 1   ;;  %s4799_s0 = inlined_call_operand.vmem [shape: s32[48,3], index: 0, kind: input, shape index: {}]   ;;  %s4800_s1 = inlined_call_operand.vmem [shape: f32[150,32], index: 1, kind: input, shape index: {}]   ;;  %s4801_s4 = inlined_call_operand.vmem [shape: f32[20,64], index: 4, kind: input, shape index: {}]   ;;  %s4802_s3 = inlined_call_operand.vmem [shape: f32[8,20], index: 3, kind: input, shape index: {}]   ;;  %s4803_s2 = inlined_call_operand.vmem [shape: f32[1,32], index: 2, kind: input, shape index: {}]   ;;  %s4804_s6 = inlined_call_operand.vmem [shape: f32[96,32], index: 6, kind: input, shape index: {}]   ;;  %s4805_s5 = inlined_call_operand.vmem [shape: f32[1,64], index: 5, kind: input, shape index: {}]   ;;  %s4806_s8 = inlined_call_operand.vmem [shape: f32[32,16], index: 8, kind: input, shape index: {}]   ;;  %s4807_s7 = inlined_call_operand.vmem [shape: f32[1,32], index: 7, kind: input, shape index: {}]   ;;  %s4808_s11 = inlined_call_operand.<no memory space> [shape: f32[1,1], index: 11, kind: input, shape index: {}]   ;;  %s4809_s9 = inlined_call_operand.vmem [shape: f32[1,16], index: 9, kind: input, shape index: {}]   ;;  %s4810_s10 = inlined_call_operand.vmem [shape: f32[1,16], index: 10, kind: input, shape index: {}]   ;;  %s4811_s12 = inlined_call_operand.vmem [shape: f32[8,1], index: 12, kind: output, shape index: {}]  }
   0x1   :  { %3343 = vset.pattern.permute.xlu1 %v3358_v0  ;;  %3341 = vset.pattern.permute.xlu0 %v3359_v1  ;;  %v43_v2 = vld [vmem:[%s4799_s0] sm:$0xff]  ;;  %v44_v3 = vld [vmem:[%s4799_s0 + $0x8] sm:$0xff]  ;;  %v205_v5 = vld [vmem:[%s4800_s1 + $0x78] sm:$0xff]  ;;  %vm235_vm0 = vcmask 1045504   ;;  %vm216_vm8 = vcmask 179200  }
   0x2   :  { %125 = vperm.xlu1 %3343, %v43_v2   ;;  %53 = vperm.xlu0 %3341, %v43_v2   ;;  %v204_v6 = vld [vmem:[%s4800_s1 + $0x70] sm:$0xff]  ;;  %v203_v7 = vld [vmem:[%s4800_s1 + $0x68] sm:$0xff]  ;;  %v3449_v8 = vand.u32 4294901760, %v205_v5  ;;  %v202_v11 = vld [vmem:[%s4800_s1 + $0x60] sm:$0xff] }
   0x3   :  { %413 = vmatprep.subr.mxu1 %v3360_v4  ;;  %239 = vmatprep.subr.mxu0 %v3360_v4  ;;  %v3451_v9 = vand.u32 4294901760, %v204_v6  ;;  %v3453_v10 = vand.u32 4294901760, %v203_v7  ;;  %v201_v12 = vld [vmem:[%s4800_s1 + $0x58] sm:$0xff]  ;;  %v200_v13 = vld [vmem:[%s4800_s1 + $0x50] sm:$0xff]  ;;  %v3464_v14 = vand.u32 4294901760, %v202_v11  ;;  %v199_v17 = vld [vmem:[%s4800_s1 + $0x48] sm:$0xff] }
   0x4   :  { %v3466_v15 = vand.u32 4294901760, %v201_v12  ;;  %v3468_v16 = vand.u32 4294901760, %v200_v13  ;;  %v3476_v19 = vsub.f32 %v205_v5, %v3449_v8  ;;  %v3487_v23 = vand.u32 4294901760, %v199_v17  ;;  %v198_v24 = vld [vmem:[%s4800_s1 + $0x40] sm:$0xff]  ;;  %241 = vmatpush1.msra.mxu0 %v3449_v8  ;;  %v197_v36 = vld [vmem:[%s4800_s1 + $0x38] sm:$0xff]  ;;  %v196_v37 = vld [vmem:[%s4800_s1 + $0x30] sm:$0xff] }
   0x5   :  { %v3479_v20 = vsub.f32 %v204_v6, %v3451_v9  ;;  %v3482_v21 = vsub.f32 %v203_v7, %v3453_v10  ;;  %v3485_v22 = vsub.f32 %v202_v11, %v3464_v14  ;;  %242 = vmatprep.subr.mxu0 %v3360_v4  ;;  %v3511_v33 = vand.u32 4294901760, %v198_v24  ;;  %v195_v42 = vld [vmem:[%s4800_s1 + $0x28] sm:$0xff]  ;;  %v45_v43 = vld [vmem:[%s4799_s0 + $0x10] sm:$0xff]  ;;  %v194_v50 = vld [vmem:[%s4800_s1 + $0x20] sm:$0xff] }
   0x6   :  { %3344 = vset.pattern.permute.xlu1 %v3359_v1  ;;  %3342 = vset.pattern.permute.xlu0 %v3361_v18  ;;  %v4830_v25 = vand.u32 4294901760, %v3476_v19  ;;  %v3496_v28 = vsub.f32 %v201_v12, %v3466_v15  ;;  %v3501_v29 = vsub.f32 %v200_v13, %v3468_v16  ;;  %v3519_v35 = vsub.f32 %v199_v17, %v3487_v23  ;;  %v193_v55 = vld [vmem:[%s4800_s1 + $0x18] sm:$0xff]  ;;  %v192_v5 = vld [vmem:[%s4800_s1 + $0x10] sm:$0xff]  ;;  %v3601_v6 = vld [vmem:[%s4799_s0 + $0x20] sm:$0xff] }
   0x7   :  { %56 = vperm.xlu1 %3344, %v44_v3   ;;  %83 = vperm.xlu0 %3342, %v43_v2   ;;  %v4829_v26 = vand.u32 4294901760, %v3479_v20  ;;  %v4828_v27 = vand.u32 4294901760, %v3482_v21  ;;  %v4827_v32 = vand.u32 4294901760, %v3485_v22  ;;  %v3541_v45 = vsub.f32 %v198_v24, %v3511_v33  ;;  %v3571_v56 = vld [vmem:[%s4799_s0 + $0x18] sm:$0xff]  ;;  %v191_v17 = vld [vmem:[%s4800_s1 + $0x8] sm:$0xff] }
   0x8   :  { %v417_v30 = vsub.f32 %v3476_v19, %v4830_v25  ;;  %244 = vmatpush1.msra.mxu0 %v3451_v9  ;;  %v4826_v39 = vand.u32 4294901760, %v3496_v28  ;;  %v4825_v41 = vand.u32 4294901760, %v3501_v29  ;;  %v3543_v46 = vand.u32 4294901760, %v197_v36 }
   0x9   :  { %v424_v31 = vsub.f32 %v3479_v20, %v4829_v26  ;;  %v431_v34 = vsub.f32 %v3482_v21, %v4828_v27  ;;  %245 = vmatprep.subr.mxu0 %v3360_v4  ;;  %v438_v44 = vsub.f32 %v3485_v22, %v4827_v32  ;;  %v3545_v47 = vand.u32 4294901760, %v196_v37 }
   0xa   :  { %v418_v38 = vand.u32 4294901760, %v417_v30  ;;  %247 = vmatpush1.msra.mxu0 %v3453_v10  ;;  %v4824_v49 = vand.u32 4294901760, %v3519_v35  ;;  %v445_v51 = vsub.f32 %v3496_v28, %v4826_v39  ;;  %v3558_v52 = vsub.f32 %v197_v36, %v3543_v46 }
   0xb   :  { %3345 = vset.pattern.permute.xlu1 %v3361_v18  ;;  %3346 = vset.pattern.permute.xlu0 %v3358_v0  ;;  %v425_v40 = vand.u32 4294901760, %v424_v31  ;;  %v432_v48 = vand.u32 4294901760, %v431_v34  ;;  %v3560_v53 = vand.u32 4294901760, %v195_v42  ;;  %v452_v54 = vsub.f32 %v3501_v29, %v4825_v41 }
   0xc   :  { %86 = vperm.xlu1 %3345, %v44_v3   ;;  %128 = vperm.xlu0 %3346, %v44_v3   ;;  %v439_v57 = vand.u32 4294901760, %v438_v44  ;;  %v4823_v58 = vand.u32 4294901760, %v3541_v45  ;;  %v3577_v59 = vsub.f32 %v196_v37, %v3545_v47  ;;  %v3579_v60 = vand.u32 4294901760, %v194_v50  ;;  %v208_v37 = vld [vmem:[%s4800_s1 + $0x90] sm:$0x3f] }
   0xd   :  { %419 = vmatpush1.msra.mxu1 %v418_v38  ;;  %248 = vmatprep.subr.mxu0 %v3360_v4  ;;  %v459_v61 = vsub.f32 %v3519_v35, %v4824_v49  ;;  %v446_v62 = vand.u32 4294901760, %v445_v51  ;;  %v4822_v63 = vand.u32 4294901760, %v3558_v52  ;;  %v3589_v2 = vsub.f32 %v195_v42, %v3560_v53 }
   0xe   :  { %420 = vmatprep.subr.mxu1 %v3360_v4  ;;  %250 = vmatpush1.msra.mxu0 %v3464_v14  ;;  %v3591_v3 = vand.u32 4294901760, %v193_v55  ;;  %v453_v7 = vand.u32 4294901760, %v452_v54  ;;  %v466_v11 = vsub.f32 %v3541_v45, %v4823_v58  ;;  %v4821_v12 = vand.u32 4294901760, %v3577_v59 }
   0xf   :  { %426 = vmatpush1.msra.mxu1 %v425_v40  ;;  %251 = vmatprep.subr.mxu0 %v3360_v4  ;;  %v3608_v13 = vsub.f32 %v194_v50, %v3579_v60  ;;  %v3615_v24 = vand.u32 4294901760, %v192_v5  ;;  %v460_v30 = vand.u32 4294901760, %v459_v61  ;;  %v473_v31 = vsub.f32 %v3558_v52, %v4822_v63  ;;  %v190_v40 = vld [vmem:[%s4800_s1] sm:$0xff] }
  0x10   :  { %3347 = vset.pattern.permute.xlu1 %v3359_v1  ;;  %131 = vperm.xlu0 %3346, %v45_v43   ;;  %v4814_v34 = vand.u32 4294901760, %v3589_v2  ;;  %v3623_v36 = vsub.f32 %v193_v55, %v3591_v3  ;;  %v3630_v38 = vand.u32 4294901760, %v191_v17  ;;  %v467_v42 = vand.u32 4294901760, %v466_v11 }
  0x11   :  { %59 = vperm.xlu1 %3347, %v45_v43   ;;  %427 = vmatprep.subr.mxu1 %v3360_v4  ;;  %v4812_v44 = vand.u32 4294901760, %v3608_v13  ;;  %v3648_v50 = vsub.f32 %v192_v5, %v3615_v24  ;;  %v237_v51 = vsel %vm235_vm0, %v208_v37, 0  ;;  %v474_v54 = vand.u32 4294901760, %v473_v31 }
  0x12   :  { %433 = vmatpush1.msra.mxu1 %v432_v48  ;;  %253 = vmatpush1.msra.mxu0 %v3466_v15  ;;  %v3644_v48 = vld [vmem:[%s4799_s0 + $0x28] sm:$0xff]  ;;  %v487_v55 = vsub.f32 %v3589_v2, %v4814_v34  ;;  %v3656_v61 = vand.u32 4294901760, %v190_v40  ;;  %v3667_v11 = vand.u32 4294901760, %v237_v51 }
  0x13   :  { %434 = vmatprep.subr.mxu1 %v3360_v4  ;;  %254 = vmatprep.subr.mxu0 %v3360_v4 }
  0x14   :  { %3350 = vset.pattern.permute.xlu0 %v3361_v18  ;;  %440 = vmatpush1.msra.mxu1 %v439_v57  ;;  %v4813_v57 = vand.u32 4294901760, %v3623_v36  ;;  %v488_v31 = vand.u32 4294901760, %v487_v55  ;;  %v3692_v55 = vsub.f32 %v237_v51, %v3667_v11 }
  0x15   :  { %3348 = vset.pattern.permute.xlu1 %v3361_v18  ;;  %92 = vperm.xlu0 %3350, %v3571_v56  }
  0x16   :  { %89 = vperm.xlu1 %3348, %v45_v43   ;;  %441 = vmatprep.subr.mxu1 %v3360_v4  ;;  %v480_v43 = vsub.f32 %v3577_v59, %v4821_v12  ;;  %v501_v37 = vsub.f32 %v3623_v36, %v4813_v57 }
  0x17   :  { %447 = vmatpush1.msra.mxu1 %v446_v62  ;;  %256 = vmatpush1.msra.mxu0 %v3468_v16  ;;  %v3661_v62 = vsub.f32 %v191_v17, %v3630_v38  ;;  %v4820_v17 = vand.u32 4294901760, %v3648_v50 }
  0x18   :  { %448 = vmatprep.subr.mxu1 %v3360_v4  ;;  %v481_v5 = vand.u32 4294901760, %v480_v43  ;;  %v206_v43 = vld [vmem:[%s4800_s1 + $0x80] sm:$0xff]  ;;  %257 = vmatprep.subr.mxu0 %v3360_v4 }
  0x19   :  { %95 = vperm.xlu0 %3350, %v3601_v6   ;;  %454 = vmatpush1.msra.mxu1 %v453_v7  ;;  %v494_v7 = vsub.f32 %v3608_v13, %v4812_v44  ;;  %v4815_v44 = vand.u32 4294901760, %v3661_v62  ;;  %v3699_v57 = vand.u32 4294901760, %v206_v43 }
  0x1a   :  { %3349 = vset.pattern.permute.xlu1 %v3359_v1  ;;  %455 = vmatprep.subr.mxu1 %v3360_v4 }
  0x1b   :  { %62 = vperm.xlu1 %3349, %v3571_v56   ;;  %461 = vmatpush1.msra.mxu1 %v460_v30  ;;  %v207_v30 = vld [vmem:[%s4800_s1 + $0x88] sm:$0xff]  ;;  %v515_v51 = vsub.f32 %v3661_v62, %v4815_v44 }
  0x1c   :  { %462 = vmatprep.subr.mxu1 %v3360_v4  ;;  %259 = vmatpush1.msra.mxu0 %v3487_v23 }
  0x1d   :  { %3354 = vset.pattern.permute.xlu0 %v3359_v1  ;;  %468 = vmatpush1.msra.mxu1 %v467_v42  ;;  %v3680_v42 = vsub.f32 %v190_v40, %v3656_v61  ;;  %v508_v40 = vsub.f32 %v3648_v50, %v4820_v17 }
  0x1e   :  { %68 = vperm.xlu0 %3354, %v3644_v48   ;;  %469 = vmatprep.subr.mxu1 %v3360_v4 }
  0x1f   :  { %3351 = vset.pattern.permute.xlu1 %v3358_v0  ;;  %475 = vmatpush1.msra.mxu1 %v474_v54  ;;  %v495_v54 = vand.u32 4294901760, %v494_v7  ;;  %v4819_v34 = vand.u32 4294901760, %v3680_v42 }
  0x20   :  { %134 = vperm.xlu1 %3351, %v3571_v56   ;;  %476 = vmatprep.subr.mxu1 %v3360_v4  ;;  %v3688_v56 = vand.u32 4294901760, %v207_v30 }
  0x21   :  { %482 = vmatpush1.msra.mxu1 %v481_v5  ;;  %260 = vmatprep.subr.mxu0 %v3360_v4  ;;  %v502_v5 = vand.u32 4294901760, %v501_v37  ;;  %v3716_v37 = vsub.f32 %v206_v43, %v3699_v57 }
  0x22   :  { %483 = vmatprep.subr.mxu1 %v3360_v4  ;;  %v3709_v7 = vsub.f32 %v207_v30, %v3688_v56  ;;  %262 = vmatpush1.msra.mxu0 %v3511_v33  ;;  %v522_v30 = vsub.f32 %v3680_v42, %v4819_v34 }
  0x23   :  { %489 = vmatpush1.msra.mxu1 %v488_v31  ;;  %263 = vmatprep.subr.mxu0 %v3360_v4  ;;  %v509_v31 = vand.u32 4294901760, %v508_v40  ;;  %v4816_v40 = vand.u32 4294901760, %v3716_v37 }
  0x24   :  { %3352 = vset.pattern.permute.xlu1 %v3359_v1  ;;  %490 = vmatprep.subr.mxu1 %v3360_v4  ;;  %v4818_v1 = vand.u32 4294901760, %v3692_v55  ;;  %v4817_v44 = vand.u32 4294901760, %v3709_v7 }
  0x25   :  { %65 = vperm.xlu1 %3352, %v3601_v6   ;;  %496 = vmatpush1.msra.mxu1 %v495_v54  ;;  %v516_v54 = vand.u32 4294901760, %v515_v51 }
  0x26   :  { %497 = vmatprep.subr.mxu1 %v3360_v4  ;;  %265 = vmatpush1.msra.mxu0 %v3543_v46  ;;  %v555_v43 = vsub.f32 %v3692_v55, %v4818_v1 }
  0x27   :  { %503 = vmatpush1.msra.mxu1 %v502_v5  ;;  %266 = vmatprep.subr.mxu0 %v3360_v4  ;;  %v523_v5 = vand.u32 4294901760, %v522_v30 }
  0x28   :  { %504 = vmatprep.subr.mxu1 %v3360_v4  ;;  %268 = vmatpush1.msra.mxu0 %v3545_v47  ;;  %v556_v51 = vand.u32 4294901760, %v555_v43 }
  0x29   :  { %3353 = vset.pattern.permute.xlu1 %v3358_v0  ;;  %510 = vmatpush1.msra.mxu1 %v509_v31  ;;  %v569_v31 = vsub.f32 %v3716_v37, %v4816_v40 }
  0x2a   :  { %137 = vperm.xlu1 %3353, %v3601_v6   ;;  %511 = vmatprep.subr.mxu1 %v3360_v4  ;;  %v562_v6 = vsub.f32 %v3709_v7, %v4817_v44 }
  0x2b   :  { %269 = vmatprep.subr.mxu0 %v3360_v4  ;;  %517 = vmatpush1.msra.mxu1 %v516_v54 }
  0x2c   :  { %271 = vmatpush1.msra.mxu0 %v3560_v53  ;;  %518 = vmatprep.subr.mxu1 %v3360_v4  ;;  %v563_v30 = vand.u32 4294901760, %v562_v6 }
  0x2d   :  { %272 = vmatprep.subr.mxu0 %v3360_v4  ;;  %524 = vmatpush1.msra.mxu1 %v523_v5 }
  0x2e   :  { %3355 = vset.pattern.permute.xlu1 %v3361_v18  ;;  %274 = vmatpush1.msra.mxu0 %v3579_v60  ;;  %v570_v18 = vand.u32 4294901760, %v569_v31 }
  0x2f   :  { %98 = vperm.xlu1 %3355, %v3644_v48   ;;  %551 = vmatprep.subr.mxu1 %v3360_v4 }
  0x30   :  { %275 = vmatprep.subr.mxu0 %v3360_v4  ;;  %557 = vmatpush2.msra.mxu1 %v556_v51 }
  0x31   :  { %277 = vmatpush1.msra.mxu0 %v3591_v3  ;;  %558 = vmatprep.subr.mxu1 %v3360_v4 }
  0x32   :  { %278 = vmatprep.subr.mxu0 %v3360_v4  ;;  %564 = vmatpush2.msra.mxu1 %v563_v30 }
  0x33   :  { %3356 = vset.pattern.permute.xlu1 %v3358_v0  ;;  %280 = vmatpush1.msra.mxu0 %v3615_v24 }
  0x34   :  { %140 = vperm.xlu1 %3356, %v3644_v48   ;;  %565 = vmatprep.subr.mxu1 %v3360_v4  ;;  %v49_v48 = vlaneseq }
  0x35   :  { %281 = vmatprep.subr.mxu0 %v3360_v4  ;;  %571 = vmatpush2.msra.mxu1 %v570_v18 }
  0x36   :  { %283 = vmatpush1.msra.mxu0 %v3630_v38  ;;  %772 = vmatprep.subr.mxu1 %v3360_v4  ;;  %v3768_v54 = vand.u32 127, %v49_v48 }
  0x37   :  { %284 = vmatprep.subr.mxu0 %v3360_v4  ;;  %3357 = vset.pattern.permute.xlu0 %v3358_v0 }
  0x38   :  { %286 = vmatpush1.msra.mxu0 %v3656_v61  ;;  %v3771_v0 = vadd.s32 128, %v3768_v54 }
  0x39   :  { %313 = vmatprep.subr.mxu0 %v3360_v4 }
  0x3a   :  { %315 = vmatpush2.msra.mxu0 %v3667_v11 }
  0x3b   :  { %316 = vmatprep.subr.mxu0 %v3360_v4 }
  0x3c   :  { %318 = vmatpush2.msra.mxu0 %v3688_v56 }
  0x3d   :  { %319 = vmatprep.subr.mxu0 %v3360_v4 }
  0x3e   :  { %321 = vmatpush2.msra.mxu0 %v3699_v57 }
  0x3f   :  { %615 = vmatprep.subr.mxu0 %v3360_v4 }
  0x7d   :  { %v126_v43 = vpop.permute.xlu1 %125  ;;  %v54_v5 = vpop.permute.xlu0 %53 }
  0x7e   :  { %vm70_vm1 = vcmp.eq.s32.totalorder %v3768_v54, %v54_v5  ;;  %vm71_vm2 = vcmp.eq.s32.totalorder %v3771_v0, %v54_v5  ;;  %vm143_vm6 = vcmp.eq.s32.totalorder %v3771_v0, %v126_v43  ;;  %vm142_vm9 = vcmp.eq.s32.totalorder %v3768_v54, %v126_v43 }
  0x82   :  { %v57_v6 = vpop.permute.xlu1 %56  ;;  %v84_v51 = vpop.permute.xlu0 %83 }
  0x83   :  { %vm100_vm3 = vcmp.eq.s32.totalorder %v3768_v54, %v84_v51  ;;  %vm101_vm4 = vcmp.eq.s32.totalorder %v3771_v0, %v84_v51  ;;  %vm72_vm11 = vcmp.eq.s32.totalorder %v3768_v54, %v57_v6  ;;  %vm73_vm0 = vcmp.eq.s32.totalorder %v3771_v0, %v57_v6 }
  0x84   :  { %vm112_vm5 = vmor %vm70_vm1, %vm100_vm3  ;;  %v4837_v51 = vmov 1.0  }
  0x85   :  { %vm113_vm7 = vmor %vm71_vm2, %vm101_vm4 }
  0x86   :  { %vm155_vm10 = vmor %vm113_vm7, %vm143_vm6 }
  0x87   :  { %v87_v31 = vpop.permute.xlu1 %86  ;;  %v3781_v30 = vsel %vm155_vm10, 1.0, %v3360_v4  ;;  %vm3783_vm12 = vmor %vm112_vm5, %vm142_vm9  ;;  %v129_v48 = vpop.permute.xlu0 %128 }
  0x88   :  { %vm102_vm13 = vcmp.eq.s32.totalorder %v3768_v54, %v87_v31  ;;  %vm103_vm14 = vcmp.eq.s32.totalorder %v3771_v0, %v87_v31  ;;  %2879 = vmatprep.mubr.msk.f32.mxu1 %vm216_vm8, %v3781_v30  ;;  %v2866_v43 = vsel %vm3783_vm12, 1.0, %v3360_v4  ;;  %vm144_vm15 = vcmp.eq.s32.totalorder %v3768_v54, %v129_v48 }
  0x89   :  { %vm114_vm1 = vmor %vm72_vm11, %vm102_vm13  ;;  %v3796_v5 = vsub.f32 %v2866_v43, %v2866_v43  ;;  %2880 = vmatmul.mubr.msk.f32.vlgmr.msra.gmra.mxu1 %vm3783_vm12, %v4837_v51  ;;  %vm145_vm2 = vcmp.eq.s32.totalorder %v3771_v0, %v129_v48  ;;  %v218_v31 = vsel %vm216_vm8, %v3781_v30, 0 }
  0x8a   :  { %vm115_vm3 = vmor %vm73_vm0, %vm103_vm14  ;;  %v3804_v40 = vsub.f32 %v218_v31, %v218_v31  ;;  %774 = vmatpush1.msra.mxu1 %v3449_v8 }
  0x8b   :  { %vm3807_vm4 = vmor %vm114_vm1, %vm144_vm15  ;;  %v4835_v43 = vand.u32 4294901760, %v3796_v5  ;;  %775 = vmatprep.subr.mxu1 %v3360_v4  ;;  %v132_v63 = vpop.permute.xlu0 %131 }
  0x8c   :  { %vm157_vm5 = vmor %vm115_vm3, %vm145_vm2  ;;  %v2868_v48 = vsel %vm3807_vm4, 1.0, %v3360_v4  ;;  %v60_v44 = vpop.permute.xlu1 %59  ;;  %v4836_v1 = vand.u32 4294901760, %v3804_v40  ;;  %777 = vmatpush1.msra.mxu1 %v3451_v9  ;;  %vm146_vm7 = vcmp.eq.s32.totalorder %v3768_v54, %v132_v63  ;;  %vm147_vm14 = vcmp.eq.s32.totalorder %v3771_v0, %v132_v63 }
  0x8d   :  { %v3818_v31 = vsub.f32 %v2868_v48, %v2868_v48  ;;  %v3821_v34 = vsel %vm157_vm5, 1.0, %v3360_v4  ;;  %778 = vmatprep.subr.mxu1 %v3360_v4  ;;  %v331_v48 = vsub.f32 %v3796_v5, %v4835_v43  ;;  %vm74_vm6 = vcmp.eq.s32.totalorder %v3768_v54, %v60_v44 }
  0x8e   :  { %v221_v17 = vsel %vm216_vm8, %v3821_v34, 0  ;;  %2881 = vmatprep.mubr.msk.f32.mxu1 %vm216_vm8, %v3821_v34  ;;  %v325_v12 = vsub.f32 %v3804_v40, %v4836_v1  ;;  %780 = vmatpush1.msra.mxu1 %v3453_v10  ;;  %vm75_vm11 = vcmp.eq.s32.totalorder %v3771_v0, %v60_v44 }
  0x8f   :  { %v3835_v58 = vsub.f32 %v221_v17, %v221_v17  ;;  %2882 = vmatmul.mubr.msk.f32.gmra.mxu1 %vm3807_vm4, %v4837_v51  ;;  %v4832_v49 = vand.u32 4294901760, %v3818_v31  ;;  %781 = vmatprep.subr.mxu1 %v3360_v4  ;;  %v332_v32 = vand.u32 4294901760, %v331_v48 }
  0x90   :  { %v326_v41 = vand.u32 4294901760, %v325_v12  ;;  %783 = vmatpush1.msra.mxu1 %v3464_v14  ;;  %v93_v44 = vpop.permute.xlu0 %92 }
  0x91   :  { %v90_v39 = vpop.permute.xlu1 %89  ;;  %v4833_v17 = vand.u32 4294901760, %v3835_v58  ;;  %784 = vmatprep.subr.mxu1 %v3360_v4  ;;  %v346_v12 = vsub.f32 %v3818_v31, %v4832_v49  ;;  %vm106_vm3 = vcmp.eq.s32.totalorder %v3768_v54, %v93_v44 }
  0x92   :  { %327 = vmatprep.mubr.f32.mxu0 %v326_v41  ;;  %vm104_vm9 = vcmp.eq.s32.totalorder %v3768_v54, %v90_v39  ;;  %vm105_vm10 = vcmp.eq.s32.totalorder %v3771_v0, %v90_v39  ;;  %786 = vmatpush1.msra.mxu1 %v3466_v15  ;;  %v4861_v39 = vmov 0 }
  0x93   :  { %vm116_vm13 = vmor %vm74_vm6, %vm104_vm9  ;;  %333 = vmatmul.mubr.f32.vlgmr.msra.gmra.mxu0 %v332_v32  ;;  %v340_v41 = vsub.f32 %v3835_v58, %v4833_v17  ;;  %787 = vmatprep.subr.mxu1 %v3360_v4  ;;  %v347_v26 = vand.u32 4294901760, %v346_v12  ;;  %vm107_vm6 = vcmp.eq.s32.totalorder %v3771_v0, %v93_v44  ;;  %v4865_v44 = vmov 0 }
  0x94   :  { %vm117_vm15 = vmor %vm75_vm11, %vm105_vm10  ;;  %618 = vmatpush1.msra.mxu0 %v3476_v19  ;;  %789 = vmatpush1.msra.mxu1 %v3468_v16 }
  0x95   :  { %vm3863_vm0 = vmor %vm116_vm13, %vm146_vm7  ;;  %v341_v32 = vand.u32 4294901760, %v340_v41  ;;  %619 = vmatprep.subr.mxu0 %v3360_v4  ;;  %790 = vmatprep.subr.mxu1 %v3360_v4 }
  0x96   :  { %v4862_v39 = vsel %vm3863_vm0, 4294967295, %v4861_v39  ;;  %vm159_vm1 = vmor %vm117_vm15, %vm147_vm14  ;;  %v2870_v48 = vsel %vm3863_vm0, 1.0, %v3360_v4  ;;  %v63_v27 = vpop.permute.xlu1 %62  ;;  %622 = vmatpush1.msra.mxu0 %v3479_v20  ;;  %792 = vmatpush1.msra.mxu1 %v3487_v23 }
  0x97   :  { %4863 = vst [vmem:[#allocation3_spill] sm:$0xff] %v4862_v39  ;;  %v3874_v63 = vsub.f32 %v2870_v48, %v2870_v48  ;;  %342 = vmatprep.mubr.f32.mxu0 %v341_v32  ;;  %v3877_v41 = vsel %vm159_vm1, 1.0, %v3360_v4  ;;  %623 = vmatprep.subr.mxu0 %v3360_v4  ;;  %vm76_vm2 = vcmp.eq.s32.totalorder %v3768_v54, %v63_v27 }
  0x98   :  { %4864 = vst [vmem:[#allocation4_spill] sm:$0xff] %v3877_v41  ;;  %348 = vmatmul.mubr.f32.gmra.mxu0 %v347_v26  ;;  %v224_v25 = vsel %vm216_vm8, %v3877_v41, 0  ;;  %2883 = vmatprep.mubr.msk.f32.mxu1 %vm216_vm8, %v3877_v41  ;;  %vm77_vm5 = vcmp.eq.s32.totalorder %v3771_v0, %v63_v27  ;;  %vm118_vm7 = vmor %vm76_vm2, %vm106_vm3 }
  0x99   :  { %v3887_v12 = vsub.f32 %v224_v25, %v224_v25  ;;  %2884 = vmatmul.mubr.msk.f32.gmra.mxu1 %vm3863_vm0, %v4837_v51  ;;  %626 = vmatpush1.msra.mxu0 %v3482_v21  ;;  %v4831_v26 = vand.u32 4294901760, %v3874_v63  ;;  %vm119_vm9 = vmor %vm77_vm5, %vm107_vm6 }
  0x9a   :  { %793 = vmatprep.subr.mxu1 %v3360_v4  ;;  %627 = vmatprep.subr.mxu0 %v3360_v4 }
  0x9b   :  { %v135_v32 = vpop.permute.xlu1 %134  ;;  %v4834_v27 = vand.u32 4294901760, %v3887_v12  ;;  %795 = vmatpush1.msra.mxu1 %v3511_v33  ;;  %630 = vmatpush1.msra.mxu0 %v3485_v22  ;;  %v361_v25 = vsub.f32 %v3874_v63, %v4831_v26 }
  0x9c   :  { %vm148_vm10 = vcmp.eq.s32.totalorder %v3768_v54, %v135_v32  ;;  %vm149_vm11 = vcmp.eq.s32.totalorder %v3771_v0, %v135_v32  ;;  %796 = vmatprep.subr.mxu1 %v3360_v4  ;;  %631 = vmatprep.subr.mxu0 %v3360_v4 }
  0x9d   :  { %vm3907_vm13 = vmor %vm118_vm7, %vm148_vm10  ;;  %v355_v48 = vsub.f32 %v3887_v12, %v4834_v27  ;;  %798 = vmatpush1.msra.mxu1 %v3543_v46  ;;  %634 = vmatpush1.msra.mxu0 %v3496_v28  ;;  %v96_v27 = vpop.permute.xlu0 %95  ;;  %v362_v51 = vand.u32 4294901760, %v361_v25 }
  0x9e   :  { %v4866_v44 = vsel %vm3907_vm13, 4294967295, %v4865_v44  ;;  %vm161_vm14 = vmor %vm119_vm9, %vm149_vm11  ;;  %v2872_v32 = vsel %vm3907_vm13, 1.0, %v3360_v4  ;;  %799 = vmatprep.subr.mxu1 %v3360_v4  ;;  %635 = vmatprep.subr.mxu0 %v3360_v4  ;;  %vm108_vm1 = vcmp.eq.s32.totalorder %v3768_v54, %v96_v27  ;;  %vm109_vm3 = vcmp.eq.s32.totalorder %v3771_v0, %v96_v27 }
  0x9f   :  { %4867 = vst [vmem:[#allocation5_spill] sm:$0xff] %v4866_v44  ;;  %v3921_v26 = vsub.f32 %v2872_v32, %v2872_v32  ;;  %v356_v49 = vand.u32 4294901760, %v355_v48  ;;  %v3924_v17 = vsel %vm161_vm14, 1.0, %v3360_v4  ;;  %801 = vmatpush1.msra.mxu1 %v3545_v47  ;;  %638 = vmatpush1.msra.mxu0 %v3501_v29  ;;  %v4869_v32 = vmov 1.0  }
  0xa0   :  { %4868 = vst [vmem:[#allocation6_spill] sm:$0xff] %v3924_v17  ;;  %v227_v43 = vsel %vm216_vm8, %v3924_v17, 0  ;;  %2885 = vmatprep.mubr.msk.f32.mxu1 %vm216_vm8, %v3924_v17  ;;  %v66_v1 = vpop.permute.xlu1 %65  ;;  %802 = vmatprep.subr.mxu1 %v3360_v4  ;;  %v4870_v27 = vmov 0 }
  0xa1   :  { %357 = vmatprep.mubr.f32.mxu0 %v356_v49  ;;  %v3933_v48 = vsub.f32 %v227_v43, %v227_v43  ;;  %2886 = vmatmul.mubr.msk.f32.gmra.mxu1 %vm3907_vm13, %v4869_v32  ;;  %v4841_v39 = vand.u32 4294901760, %v3921_v26  ;;  %vm78_vm15 = vcmp.eq.s32.totalorder %v3768_v54, %v66_v1  ;;  %vm79_vm2 = vcmp.eq.s32.totalorder %v3771_v0, %v66_v1 }
  0xa2   :  { %363 = vmatmul.mubr.f32.gmra.mxu0 %v362_v51  ;;  %639 = vmatprep.subr.mxu0 %v3360_v4  ;;  %vm120_vm5 = vmor %vm78_vm15, %vm108_vm1 }
  0xa3   :  { %804 = vmatpush1.msra.mxu1 %v3560_v53  ;;  %642 = vmatpush1.msra.mxu0 %v3519_v35  ;;  %v4842_v49 = vand.u32 4294901760, %v3933_v48  ;;  %v376_v51 = vsub.f32 %v3921_v26, %v4841_v39  ;;  %vm121_vm6 = vmor %vm79_vm2, %vm109_vm3 }
  0xa4   :  { %805 = vmatprep.subr.mxu1 %v3360_v4  ;;  %643 = vmatprep.subr.mxu0 %v3360_v4 }
  0xa5   :  { %v138_v43 = vpop.permute.xlu1 %137  ;;  %v370_v1 = vsub.f32 %v3933_v48, %v4842_v49  ;;  %807 = vmatpush1.msra.mxu1 %v3579_v60  ;;  %646 = vmatpush1.msra.mxu0 %v3541_v45  ;;  %v377_v49 = vand.u32 4294901760, %v376_v51 }
  0xa6   :  { %vm150_vm7 = vcmp.eq.s32.totalorder %v3768_v54, %v138_v43  ;;  %vm151_vm9 = vcmp.eq.s32.totalorder %v3771_v0, %v138_v43  ;;  %808 = vmatprep.subr.mxu1 %v3360_v4  ;;  %647 = vmatprep.subr.mxu0 %v3360_v4 }
  0xa7   :  { %vm3961_vm10 = vmor %vm120_vm5, %vm150_vm7  ;;  %v371_v25 = vand.u32 4294901760, %v370_v1  ;;  %810 = vmatpush1.msra.mxu1 %v3591_v3  ;;  %650 = vmatpush1.msra.mxu0 %v3558_v52  ;;  %v69_v1 = vpop.permute.xlu0 %68 }
  0xa8   :  { %v4871_v27 = vsel %vm3961_vm10, 4294967295, %v4870_v27  ;;  %vm163_vm11 = vmor %vm121_vm6, %vm151_vm9  ;;  %v2874_v39 = vsel %vm3961_vm10, 1.0, %v3360_v4  ;;  %811 = vmatprep.subr.mxu1 %v3360_v4  ;;  %651 = vmatprep.subr.mxu0 %v3360_v4  ;;  %vm80_vm15 = vcmp.eq.s32.totalorder %v3768_v54, %v69_v1  ;;  %vm81_vm2 = vcmp.eq.s32.totalorder %v3771_v0, %v69_v1 }
  0xa9   :  { %4872 = vst [vmem:[#allocation7_spill] sm:$0xff] %v4871_v27  ;;  %v3972_v43 = vsub.f32 %v2874_v39, %v2874_v39  ;;  %372 = vmatprep.mubr.f32.mxu0 %v371_v25  ;;  %v3975_v44 = vsel %vm163_vm11, 1.0, %v3360_v4  ;;  %813 = vmatpush1.msra.mxu1 %v3615_v24 }
  0xaa   :  { %378 = vmatmul.mubr.f32.gmra.mxu0 %v377_v49  ;;  %v230_v17 = vsel %vm216_vm8, %v3975_v44, 0  ;;  %2887 = vmatprep.mubr.msk.f32.mxu1 %vm216_vm8, %v3975_v44  ;;  %v99_v51 = vpop.permute.xlu1 %98 }
  0xab   :  { %v3982_v41 = vsub.f32 %v230_v17, %v230_v17  ;;  %2888 = vmatmul.mubr.msk.f32.gmra.mxu1 %vm3961_vm10, %v4869_v32  ;;  %654 = vmatpush1.msra.mxu0 %v3577_v59  ;;  %v4849_v39 = vand.u32 4294901760, %v3972_v43  ;;  %vm110_vm14 = vcmp.eq.s32.totalorder %v3768_v54, %v99_v51  ;;  %vm111_vm1 = vcmp.eq.s32.totalorder %v3771_v0, %v99_v51 }
  0xac   :  { %814 = vmatprep.subr.mxu1 %v3360_v4  ;;  %655 = vmatprep.subr.mxu0 %v3360_v4  ;;  %vm122_vm3 = vmor %vm80_vm15, %vm110_vm14  ;;  %v4873_v51 = vmov 0  ;;  %vm1245_vm14 = vcmask 1043456   ;;  %vm1241_vm15 = vcmask 162816  }
  0xad   :  { %816 = vmatpush1.msra.mxu1 %v3630_v38  ;;  %658 = vmatpush1.msra.mxu0 %v3589_v2  ;;  %v4850_v17 = vand.u32 4294901760, %v3982_v41  ;;  %v391_v49 = vsub.f32 %v3972_v43, %v4849_v39  ;;  %vm123_vm5 = vmor %vm81_vm2, %vm111_vm1 }
  0xae   :  { %817 = vmatprep.subr.mxu1 %v3360_v4  ;;  %659 = vmatprep.subr.mxu0 %v3360_v4 }
  0xaf   :  { %v141_v25 = vpop.permute.xlu1 %140  ;;  %819 = vmatpush1.msra.mxu1 %v3656_v61  ;;  %662 = vmatpush1.msra.mxu0 %v3608_v13  ;;  %v385_v1 = vsub.f32 %v3982_v41, %v4850_v17  ;;  %v392_v17 = vand.u32 4294901760, %v391_v49 }
  0xb0   :  { %vm152_vm6 = vcmp.eq.s32.totalorder %v3768_v54, %v141_v25  ;;  %vm153_vm7 = vcmp.eq.s32.totalorder %v3771_v0, %v141_v25  ;;  %846 = vmatprep.subr.mxu1 %v3360_v4  ;;  %663 = vmatprep.subr.mxu0 %v3360_v4 }
  0xb1   :  { %vm4012_vm9 = vmor %vm122_vm3, %vm152_vm6  ;;  %v386_v39 = vand.u32 4294901760, %v385_v1  ;;  %848 = vmatpush2.msra.mxu1 %v3667_v11  ;;  %666 = vmatpush1.msra.mxu0 %v3623_v36 }
  0xb2   :  { %v4874_v51 = vsel %vm4012_vm9, 4294967295, %v4873_v51  ;;  %vm165_vm11 = vmor %vm123_vm5, %vm153_vm7  ;;  %v2876_v54 = vsel %vm4012_vm9, 1.0, %v3360_v4  ;;  %849 = vmatprep.subr.mxu1 %v3360_v4  ;;  %667 = vmatprep.subr.mxu0 %v3360_v4 }
  0xb3   :  { %4875 = vst [vmem:[#allocation8_spill] sm:$0xff] %v4874_v51  ;;  %v4023_v0 = vsub.f32 %v2876_v54, %v2876_v54  ;;  %387 = vmatprep.mubr.f32.mxu0 %v386_v39  ;;  %v4026_v25 = vsel %vm165_vm11, 1.0, %v3360_v4  ;;  %851 = vmatpush2.msra.mxu1 %v3688_v56 }
  0xb4   :  { %4876 = vst [vmem:[#allocation9_spill] sm:$0xff] %v4026_v25  ;;  %393 = vmatmul.mubr.f32.gmra.mxu0 %v392_v17  ;;  %v233_v1 = vsel %vm216_vm8, %v4026_v25, 0  ;;  %2889 = vmatprep.mubr.msk.f32.mxu1 %vm216_vm8, %v4026_v25  ;;  %v4877_v17 = vand.u32 4294901760, %v3804_v40  ;;  %v4880_v25 = vand.u32 4294901760, %v3835_v58 }
  0xb5   :  { %v4033_v49 = vsub.f32 %v233_v1, %v233_v1  ;;  %2890 = vmatmul.mubr.msk.f32.gmra.mxu1 %vm4012_vm9, %v4869_v32  ;;  %670 = vmatpush1.msra.mxu0 %v3648_v50  ;;  %v4878_v1 = vand.u32 4294901760, %v3796_v5  ;;  %v4879_v51 = vand.u32 4294901760, %v4023_v0 }
  0xb6   :  { %852 = vmatprep.subr.mxu1 %v3360_v4  ;;  %858 = vmatprep.mubr.f32.mxu1 %v4877_v17 }
  0xb7   :  { %671 = vmatprep.subr.mxu0 %v3360_v4  ;;  %854 = vmatpush2.msra.mxu1 %v3699_v57  ;;  %v399_v54 = vand.u32 4294901760, %v4033_v49  ;;  %v406_v17 = vsub.f32 %v4023_v0, %v4879_v51  ;;  %v4882_v51 = vand.u32 4294901760, %v3887_v12 }
  0xb8   :  { %674 = vmatpush1.msra.mxu0 %v3661_v62  ;;  %1086 = vmatprep.subr.mxu1 %v3360_v4 }
  0xb9   :  { %675 = vmatprep.subr.mxu0 %v3360_v4  ;;  %862 = vmatmul.mubr.f32.vlgmr.msra.gmra.mxu1 %v4878_v1  ;;  %v400_v39 = vsub.f32 %v4033_v49, %v399_v54  ;;  %v407_v1 = vand.u32 4294901760, %v406_v17 }
  0xba   :  { %1088 = vmatpush1.msra.mxu1 %v3449_v8  ;;  %678 = vmatpush1.msra.mxu0 %v3680_v42  ;;  %v4881_v8 = vand.u32 4294901760, %v3818_v31 }
  0xbb   :  { %869 = vmatprep.mubr.f32.mxu1 %v4880_v25  ;;  %1089 = vmatprep.subr.mxu1 %v3360_v4  ;;  %v401_v27 = vand.u32 4294901760, %v400_v39  ;;  %v4913_v25 = vld [vmem:[#allocation9_spill] sm:$0xff] }
  0xbc   :  { %705 = vmatprep.subr.mxu0 %v3360_v4  ;;  %1091 = vmatpush1.msra.mxu1 %v3451_v9  ;;  %v4883_v9 = vand.u32 4294901760, %v3874_v63 }
  0xbd   :  { %708 = vmatpush2.msra.mxu0 %v3692_v55  ;;  %1092 = vmatprep.subr.mxu1 %v3360_v4 }
  0xbe   :  { %402 = vmatprep.mubr.f32.mxu0 %v401_v27  ;;  %709 = vmatprep.subr.mxu0 %v3360_v4  ;;  %v4910_v27 = vld [vmem:[#allocation6_spill] sm:$0xff] }
  0xbf   :  { %873 = vmatmul.mubr.f32.gmra.mxu1 %v4881_v8  ;;  %408 = vmatmul.mubr.f32.gmra.mxu0 %v407_v1 }
  0xc0   :  { %1094 = vmatpush1.msra.mxu1 %v3453_v10  ;;  %712 = vmatpush2.msra.mxu0 %v3709_v7  ;;  %v4884_v10 = vand.u32 4294901760, %v3933_v48 }
  0xc1   :  { %880 = vmatprep.mubr.f32.mxu1 %v4882_v51  ;;  %1095 = vmatprep.subr.mxu1 %v3360_v4  ;;  %v4342_v51 = vld [vmem:[%s4803_s2] ss:$0 sm:$0xff] }
  0xc2   :  { %713 = vmatprep.subr.mxu0 %v3360_v4  ;;  %719 = vmatprep.mubr.f32.mxu0 %v3804_v40  ;;  %v4885_v40 = vand.u32 4294901760, %v3476_v19  ;;  %v4888_v19 = vand.u32 4294901760, %v3982_v41 }
  0xc3   :  { %1097 = vmatpush1.msra.mxu1 %v3464_v14  ;;  %716 = vmatpush2.msra.mxu0 %v3716_v37  ;;  %v4886_v14 = vand.u32 4294901760, %v3479_v20  ;;  %v4891_v20 = vand.u32 4294901760, %v3972_v43 }
  0xc4   :  { %1098 = vmatprep.subr.mxu1 %v3360_v4  ;;  %884 = vmatmul.mubr.f32.gmra.mxu1 %v4883_v9 }
  0xc5   :  { %922 = vmatprep.subr.mxu0 %v3360_v4  ;;  %1100 = vmatpush1.msra.mxu1 %v3466_v15  ;;  %v4887_v15 = vand.u32 4294901760, %v3921_v26 }
  0xc6   :  { %722 = vmatmul.mubr.f32.vlgmr.msra.gmra.mxu0 %v3796_v5  ;;  %891 = vmatprep.mubr.f32.mxu1 %v4884_v10 }
  0xc7   :  { %926 = vmatpush1.msra.mxu0 %v4885_v40  ;;  %1101 = vmatprep.subr.mxu1 %v3360_v4 }
  0xc8   :  { %728 = vmatprep.mubr.f32.mxu0 %v3835_v58  ;;  %927 = vmatprep.subr.mxu0 %v3360_v4  ;;  %v4889_v58 = vand.u32 4294901760, %v3482_v21  ;;  %v4892_v21 = vand.u32 4294901760, %v3496_v28  ;;  %v4894_v28 = vand.u32 4294901760, %v4023_v0 }
  0xc9   :  { %1103 = vmatpush1.msra.mxu1 %v3468_v16  ;;  %931 = vmatpush1.msra.mxu0 %v4886_v14  ;;  %v4890_v16 = vand.u32 4294901760, %v3485_v22  ;;  %v4893_v22 = vand.u32 4294901760, %v3501_v29 }
  0xca   :  { %1104 = vmatprep.subr.mxu1 %v3360_v4  ;;  %895 = vmatmul.mubr.f32.gmra.mxu1 %v4887_v15 }
  0xcb   :  { %932 = vmatprep.subr.mxu0 %v3360_v4  ;;  %1106 = vmatpush1.msra.mxu1 %v3487_v23  ;;  %v1233_v23 = vld [vmem:[%s4801_s4 + $0x10] sm:$0xf] }
  0xcc   :  { %731 = vmatmul.mubr.f32.gmra.mxu0 %v3818_v31  ;;  %902 = vmatprep.mubr.f32.mxu1 %v4888_v19  ;;  %v1247_v29 = vsel %vm1245_vm14, %v1233_v23, 0  ;;  %v4901_v31 = vand.u32 4294901760, %v3623_v36  ;;  %v1737_v23 = vld [vmem:[%s4804_s6 + $0x50] sm:$0xff] }
  0xcd   :  { %936 = vmatpush1.msra.mxu0 %v4889_v58  ;;  %1107 = vmatprep.subr.mxu1 %v3360_v4 }
  0xce   :  { %737 = vmatprep.mubr.f32.mxu0 %v3887_v12  ;;  %937 = vmatprep.subr.mxu0 %v3360_v4  ;;  %v4906_v12 = vld [vmem:[#allocation4_spill] sm:$0xff] }
  0xcf   :  { %1109 = vmatpush1.msra.mxu1 %v3511_v33  ;;  %941 = vmatpush1.msra.mxu0 %v4890_v16  ;;  %v4895_v33 = vand.u32 4294901760, %v3519_v35  ;;  %v1232_v35 = vld [vmem:[%s4801_s4 + $0x8] sm:$0xff] }
  0xd0   :  { %1110 = vmatprep.subr.mxu1 %v3360_v4  ;;  %906 = vmatmul.mubr.f32.gmra.mxu1 %v4891_v20 }
  0xd1   :  { %942 = vmatprep.subr.mxu0 %v3360_v4  ;;  %1112 = vmatpush1.msra.mxu1 %v3543_v46  ;;  %v4896_v46 = vand.u32 4294901760, %v3541_v45 }
  0xd2   :  { %740 = vmatmul.mubr.f32.gmra.mxu0 %v3874_v63  ;;  %913 = vmatprep.mubr.f32.mxu1 %v399_v54 }
  0xd3   :  { %946 = vmatpush1.msra.mxu0 %v4892_v21  ;;  %1113 = vmatprep.subr.mxu1 %v3360_v4 }
  0xd4   :  { %746 = vmatprep.mubr.f32.mxu0 %v3933_v48  ;;  %947 = vmatprep.subr.mxu0 %v3360_v4  ;;  %v4908_v48 = vand.u32 4294901760, %v3716_v37 }
  0xd5   :  { %1115 = vmatpush1.msra.mxu1 %v3545_v47  ;;  %951 = vmatpush1.msra.mxu0 %v4893_v22  ;;  %v4141_v47 = vand.u32 4294901760, %v1247_v29  ;;  %v1738_v22 = vld [vmem:[%s4804_s6 + $0x58] sm:$0xff] }
  0xd6   :  { %1116 = vmatprep.subr.mxu1 %v3360_v4  ;;  %917 = vmatmul.mubr.f32.gmra.mxu1 %v4894_v28  ;;  %v1736_v28 = vld [vmem:[%s4804_s6 + $0x48] sm:$0xff] }
  0xd7   :  { %952 = vmatprep.subr.mxu0 %v3360_v4  ;;  %1118 = vmatpush1.msra.mxu1 %v3560_v53  ;;  %v4897_v53 = vand.u32 4294901760, %v3558_v52  ;;  %v4156_v45 = vsub.f32 %v1247_v29, %v4141_v47  ;;  %v4899_v52 = vand.u32 4294901760, %v3589_v2  ;;  %v4900_v2 = vand.u32 4294901760, %v3608_v13 }
  0xd8   :  { %749 = vmatmul.mubr.f32.gmra.mxu0 %v3921_v26  ;;  %1119 = vmatprep.subr.mxu1 %v3360_v4  ;;  %v4902_v13 = vand.u32 4294901760, %v3648_v50  ;;  %v4904_v50 = vand.u32 4294901760, %v3680_v42  ;;  %v4907_v42 = vand.u32 4294901760, %v3709_v7  ;;  %v1230_v26 = vld [vmem:[%s4802_s3] sm:$0xff] }
  0xd9   :  { %956 = vmatpush1.msra.mxu0 %v4895_v33  ;;  %2903 = vmatprep.mubr.msk.f32.mxu1 %vm216_vm8, %v3781_v30  ;;  %v1356_v5 = vand.u32 4294901760, %v4156_v45  ;;  %v4361_v33 = vand.u32 4294901760, %v1738_v22 }
  0xda   :  { %755 = vmatprep.mubr.f32.mxu0 %v3982_v41  ;;  %957 = vmatprep.subr.mxu0 %v3360_v4 }
  0xdb   :  { %1121 = vmatpush1.msra.mxu1 %v3579_v60  ;;  %961 = vmatpush1.msra.mxu0 %v4896_v46  ;;  %v4158_v60 = vand.u32 4294901760, %v1232_v35  ;;  %v4363_v46 = vand.u32 4294901760, %v1737_v23 }
  0xdc   :  { %1122 = vmatprep.subr.mxu1 %v3360_v4  ;;  %962 = vmatprep.subr.mxu0 %v3360_v4 }
  0xdd   :  { %1124 = vmatpush1.msra.mxu1 %v3591_v3  ;;  %758 = vmatmul.mubr.f32.gmra.mxu0 %v3972_v43  ;;  %v4898_v3 = vand.u32 4294901760, %v3577_v59  ;;  %v1231_v59 = vld [vmem:[%s4801_s4] sm:$0xff]  ;;  %v1243_v43 = vsel %vm1241_vm15, %v1230_v26, 0 }
  0xde   :  { %966 = vmatpush1.msra.mxu0 %v4897_v53  ;;  %1125 = vmatprep.subr.mxu1 %v3360_v4  ;;  %v1317_v18 = vand.u32 4294901760, %v1243_v43  ;;  %v1734_v53 = vld [vmem:[%s4804_s6 + $0x38] sm:$0xff] }
  0xdf   :  { %764 = vmatprep.mubr.f32.mxu0 %v4033_v49  ;;  %967 = vmatprep.subr.mxu0 %v3360_v4 }
  0xe0   :  { %1127 = vmatpush1.msra.mxu1 %v3615_v24  ;;  %971 = vmatpush1.msra.mxu0 %v4898_v3  ;;  %v4172_v24 = vsub.f32 %v1232_v35, %v4158_v60  ;;  %v1318_v6 = vsub.f32 %v1243_v43, %v1317_v18  ;;  %v1735_v35 = vld [vmem:[%s4804_s6 + $0x40] sm:$0xff] }
  0xe1   :  { %1128 = vmatprep.subr.mxu1 %v3360_v4  ;;  %972 = vmatprep.subr.mxu0 %v3360_v4  ;;  %v4376_v3 = vand.u32 4294901760, %v1735_v35 }
  0xe2   :  { %1130 = vmatpush1.msra.mxu1 %v3630_v38  ;;  %767 = vmatmul.mubr.f32.gmra.mxu0 %v4023_v0  ;;  %v4185_v38 = vand.u32 4294901760, %v1231_v59  ;;  %v1319_v39 = vand.u32 4294901760, %v1318_v6  ;;  %v1729_v0 = vld [vmem:[%s4804_s6 + $0x10] sm:$0xff] }
  0xe3   :  { %976 = vmatpush1.msra.mxu0 %v4899_v52  ;;  %1131 = vmatprep.subr.mxu1 %v3360_v4  ;;  %v4378_v52 = vand.u32 4294901760, %v1734_v53 }
  0xe4   :  { %977 = vmatprep.subr.mxu0 %v3360_v4  ;;  %2891 = vmatprep.mubr.msk.f32.mxu0 %vm216_vm8, %v3781_v30  ;;  %v1357_v30 = vsub.f32 %v4156_v45, %v1356_v5  ;;  %v4202_v36 = vsub.f32 %v1231_v59, %v4185_v38  ;;  %v1320_v54 = vsub.f32 %v1318_v6, %v1319_v39 }
  0xe5   :  { %1133 = vmatpush1.msra.mxu1 %v3656_v61  ;;  %981 = vmatpush1.msra.mxu0 %v4900_v2  ;;  %v1363_v61 = vand.u32 4294901760, %v4172_v24 }
  0xe6   :  { %1160 = vmatprep.subr.mxu1 %v3360_v4  ;;  %982 = vmatprep.subr.mxu0 %v3360_v4  ;;  %v1358_v63 = vand.u32 4294901760, %v1357_v30 }
  0xe7   :  { %1162 = vmatpush2.msra.mxu1 %v3667_v11  ;;  %986 = vmatpush1.msra.mxu0 %v4901_v31  ;;  %v4903_v11 = vand.u32 4294901760, %v3661_v62  ;;  %v4905_v62 = vand.u32 4294901760, %v3692_v55  ;;  %v4390_v31 = vsub.f32 %v1737_v23, %v4363_v46 }
  0xe8   :  { %1163 = vmatprep.subr.mxu1 %v3360_v4  ;;  %987 = vmatprep.subr.mxu0 %v3360_v4 }
  0xe9   :  { %1165 = vmatpush2.msra.mxu1 %v3688_v56  ;;  %991 = vmatpush1.msra.mxu0 %v4902_v13  ;;  %v1364_v56 = vsub.f32 %v4172_v24, %v1363_v61  ;;  %v4397_v13 = vsub.f32 %v1735_v35, %v4376_v3 }
  0xea   :  { %1166 = vmatprep.subr.mxu1 %v3360_v4  ;;  %992 = vmatprep.subr.mxu0 %v3360_v4 }
  0xeb   :  { %1168 = vmatpush2.msra.mxu1 %v3699_v57  ;;  %996 = vmatpush1.msra.mxu0 %v4903_v11  ;;  %v1370_v57 = vand.u32 4294901760, %v4202_v36  ;;  %v1365_v41 = vand.u32 4294901760, %v1364_v56  ;;  %v1731_v56 = vld [vmem:[%s4804_s6 + $0x20] sm:$0xff] }
  0xec   :  { %2904 = vmatmul.mubr.msk.f32.vlgmr.msra.gmra.mxu1 %vm3783_vm12, %v4869_v32  ;;  %997 = vmatprep.subr.mxu0 %v3360_v4 }
  0xed   :  { %2905 = vmatprep.mubr.msk.f32.mxu1 %vm216_vm8, %v3821_v34  ;;  %1001 = vmatpush1.msra.mxu0 %v4904_v50  ;;  %v1371_v55 = vsub.f32 %v4202_v36, %v1370_v57 }
  0xee   :  { %1028 = vmatprep.subr.mxu0 %v3360_v4  ;;  %3061 = vmatprep.subr.mxu1 %v3360_v4 }
  0xef   :  { %1032 = vmatpush2.msra.mxu0 %v4905_v62  ;;  %3062 = vmatpush3.msra.mxu1 %v1358_v63  ;;  %v1372_v37 = vand.u32 4294901760, %v1371_v55  ;;  %v1855_v62 = vand.u32 4294901760, %v4390_v31 }
  0xf0   :  { %2906 = vmatmul.mubr.msk.f32.gmra.mxu1 %vm3807_vm4, %v4869_v32  ;;  %1033 = vmatprep.subr.mxu0 %v3360_v4 }
  0xf1   :  { %2907 = vmatprep.mubr.msk.f32.mxu1 %vm216_vm8, %v4906_v12  ;;  %1037 = vmatpush2.msra.mxu0 %v4907_v42 }
  0xf2   :  { %1038 = vmatprep.subr.mxu0 %v3360_v4  ;;  %3063 = vmatprep.subr.mxu1 %v3360_v4 }
  0xf3   :  { %1042 = vmatpush2.msra.mxu0 %v4908_v48  ;;  %3064 = vmatpush3.msra.mxu1 %v1365_v41  ;;  %v1856_v48 = vsub.f32 %v4390_v31, %v1855_v62 }
  0xf4   :  { %2908 = vmatmul.mubr.msk.f32.gmra.mxu1 %vm3863_vm0, %v4869_v32  ;;  %2892 = vmatmul.mubr.msk.f32.vlgmr.msra.gmra.mxu0 %vm3783_vm12, %v4869_v32  ;;  %vm3363_vm12 = vmmov 0  }
  0xf5   :  { %2909 = vmatprep.mubr.msk.f32.mxu1 %vm216_vm8, %v4910_v27  ;;  %3052 = vmatprep.subr.mxu0 %v3360_v4 }
  0xf6   :  { %2893 = vmatprep.mubr.msk.f32.mxu0 %vm216_vm8, %v3821_v34  ;;  %3053 = vmatpush3.msra.mxu0 %v4141_v47  ;;  %v1857_v34 = vand.u32 4294901760, %v1856_v48 }
  0xf7   :  { %3054 = vmatprep.subr.mxu0 %v3360_v4  ;;  %3065 = vmatprep.subr.mxu1 %v3360_v4 }
  0xf8   :  { %2910 = vmatmul.mubr.msk.f32.gmra.mxu1 %vm3907_vm13, %v4869_v32  ;;  %2894 = vmatmul.mubr.msk.f32.gmra.mxu0 %vm3807_vm4, %v4869_v32  ;;  %vm1746_vm4 = vcmask 785408  }
  0xf9   :  { %2911 = vmatprep.mubr.msk.f32.mxu1 %vm216_vm8, %v3975_v44  ;;  %2895 = vmatprep.mubr.msk.f32.mxu0 %vm216_vm8, %v4906_v12  ;;  %v1869_v12 = vand.u32 4294901760, %v4397_v13 }
  0xfa   :  { %3055 = vmatpush3.msra.mxu0 %v4158_v60  ;;  %3066 = vmatpush3.msra.mxu1 %v1372_v37  ;;  %v1730_v37 = vld [vmem:[%s4804_s6 + $0x18] sm:$0xff] }
  0xfb   :  { %3056 = vmatprep.subr.mxu0 %v3360_v4  ;;  %3079 = vmatprep.subr.mxu1 %v3360_v4 }
  0xfc   :  { %2912 = vmatmul.mubr.msk.f32.gmra.mxu1 %vm3961_vm10, %v4869_v32  ;;  %2896 = vmatmul.mubr.msk.f32.gmra.mxu0 %vm3863_vm0, %v4869_v32  ;;  %vm2848_vm0 = vcmask 130048  }
  0xfd   :  { %2913 = vmatprep.mubr.msk.f32.mxu1 %vm216_vm8, %v4913_v25  ;;  %2897 = vmatprep.mubr.msk.f32.mxu0 %vm216_vm8, %v4910_v27  ;;  %v4433_v27 = vand.u32 4294901760, %v1731_v56 }
  0xfe   :  { %3057 = vmatpush3.msra.mxu0 %v4185_v38 }
  0xff   :  { %3070 = vmatprep.subr.mxu0 %v3360_v4 }
 0x100   :  { %2914 = vmatmul.mubr.msk.f32.gmra.mxu1 %vm4012_vm9, %v4869_v32  ;;  %2898 = vmatmul.mubr.msk.f32.gmra.mxu0 %vm3907_vm13, %v4869_v32  ;;  %vm2860_vm13 = vcmask 7168  }
 0x101   :  { %2899 = vmatprep.mubr.msk.f32.mxu0 %vm216_vm8, %v3975_v44  ;;  %3067 = vmatprep.mubr.msk.f32.mxu1 %vm3363_vm12, %v3360_v4  ;;  %v1321_v44 = vand.u32 4294901760, %v1320_v54 }
 0x104   :  { %2900 = vmatmul.mubr.msk.f32.gmra.mxu0 %vm3961_vm10, %v4869_v32  ;;  %3068 = vmatmul.mubr.f32.vlgmr.msra.gmra.mxu1 %v1317_v18 }
 0x105   :  { %2901 = vmatprep.mubr.msk.f32.mxu0 %vm216_vm8, %v4913_v25  ;;  %3080 = vmatpush3.msra.mxu1 %v4141_v47  ;;  %v4448_v25 = vsub.f32 %v1731_v56, %v4433_v27  ;;  %vm1218_vm8 = vcmask 261120  }
 0x106   :  { %3081 = vmatprep.subr.mxu1 %v3360_v4  ;;  %3085 = vmatprep.mubr.msk.f32.mxu1 %vm3363_vm12, %v3360_v4 }
 0x107   :  { %3082 = vmatpush3.msra.mxu1 %v4158_v60 }
 0x108   :  { %2902 = vmatmul.mubr.msk.f32.gmra.mxu0 %vm4012_vm9, %v4869_v32  ;;  %3083 = vmatprep.subr.mxu1 %v3360_v4 }
 0x109   :  { %3058 = vmatprep.mubr.msk.f32.mxu0 %vm3363_vm12, %v3360_v4  ;;  %3084 = vmatpush3.msra.mxu1 %v4185_v38 }
 0x10a   :  { %3097 = vmatprep.subr.mxu1 %v3360_v4  ;;  %3086 = vmatmul.mubr.f32.vlgmr.msra.gmra.mxu1 %v1319_v39 }
 0x10b   :  { %3098 = vmatpush3.msra.mxu1 %v4141_v47  ;;  %3103 = vmatprep.mubr.msk.f32.mxu1 %vm3363_vm12, %v3360_v4  ;;  %v4365_v47 = vand.u32 4294901760, %v1736_v28 }
 0x10c   :  { %3059 = vmatmul.mubr.f32.vlgmr.msra.gmra.mxu0 %v1321_v44  ;;  %3099 = vmatprep.subr.mxu1 %v3360_v4 }
 0x10d   :  { %3071 = vmatpush3.msra.mxu0 %v4156_v45  ;;  %3076 = vmatprep.mubr.msk.f32.mxu0 %vm3363_vm12, %v3360_v4  ;;  %v1733_v45 = vld [vmem:[%s4804_s6 + $0x30] sm:$0xff]  ;;  %v4393_v30 = vsub.f32 %v1736_v28, %v4365_v47 }
 0x10e   :  { %3072 = vmatprep.subr.mxu0 %v3360_v4  ;;  %3100 = vmatpush3.msra.mxu1 %v4158_v60 }
 0x10f   :  { %3073 = vmatpush3.msra.mxu0 %v4172_v24  ;;  %3101 = vmatprep.subr.mxu1 %v3360_v4  ;;  %v1732_v24 = vld [vmem:[%s4804_s6 + $0x28] sm:$0xff]  ;;  %v1862_v41 = vand.u32 4294901760, %v4393_v30 }
 0x110   :  { %3074 = vmatprep.subr.mxu0 %v3360_v4  ;;  %3102 = vmatpush3.msra.mxu1 %v4185_v38  ;;  %v4387_v38 = vsub.f32 %v1738_v22, %v4361_v33  ;;  %v4406_v63 = vand.u32 4294901760, %v1732_v24 }
 0x111   :  { %3075 = vmatpush3.msra.mxu0 %v4202_v36  ;;  %3104 = vmatmul.mubr.f32.vlgmr.msra.gmra.mxu1 %v1317_v18  ;;  %v4400_v36 = vsub.f32 %v1734_v53, %v4378_v52  ;;  %v1863_v7 = vsub.f32 %v4393_v30, %v1862_v41 }
 0x112   :  { %3077 = vmatmul.mubr.f32.vlgmr.msra.gmra.mxu0 %v1318_v6  ;;  %3088 = vmatprep.subr.mxu0 %v3360_v4  ;;  %v4421_v55 = vsub.f32 %v1732_v24, %v4406_v63  ;;  %v1870_v6 = vsub.f32 %v4397_v13, %v1869_v12 }
 0x113   :  { %3089 = vmatpush3.msra.mxu0 %v1356_v5  ;;  %3094 = vmatprep.mubr.msk.f32.mxu0 %vm3363_vm12, %v3360_v4  ;;  %v4380_v5 = vand.u32 4294901760, %v1733_v45  ;;  %v1876_v42 = vand.u32 4294901760, %v4400_v36 }
 0x114   :  { %3090 = vmatprep.subr.mxu0 %v3360_v4  ;;  %3133 = vmatprep.subr.mxu1 %v3360_v4  ;;  %v1890_v54 = vand.u32 4294901760, %v4421_v55 }
 0x115   :  { %3091 = vmatpush3.msra.mxu0 %v1363_v61  ;;  %3157 = vmatprep.mubr.msk.f32.mxu1 %vm3363_vm12, %v3360_v4  ;;  %v4404_v11 = vsub.f32 %v1733_v45, %v4380_v5  ;;  %v1877_v39 = vsub.f32 %v4400_v36, %v1876_v42 }
 0x116   :  { %3092 = vmatprep.subr.mxu0 %v3360_v4  ;;  %v1891_v23 = vsub.f32 %v4421_v55, %v1890_v54 }
 0x117   :  { %3093 = vmatpush3.msra.mxu0 %v1370_v57  ;;  %v1848_v57 = vand.u32 4294901760, %v4387_v38  ;;  %v1883_v43 = vand.u32 4294901760, %v4404_v11  ;;  %v1878_v22 = vand.u32 4294901760, %v1877_v39 }
 0x118   :  { %3095 = vmatmul.mubr.f32.vlgmr.msra.gmra.mxu0 %v1317_v18  ;;  %3106 = vmatprep.subr.mxu0 %v3360_v4  ;;  %v1892_v45 = vand.u32 4294901760, %v1891_v23 }
 0x119   :  { %3130 = vmatprep.mubr.msk.f32.mxu0 %vm3363_vm12, %v3360_v4  ;;  %3107 = vmatpush3.msra.mxu0 %v4361_v33  ;;  %v1849_v26 = vsub.f32 %v4387_v38, %v1848_v57 }
 0x11a   :  { %3108 = vmatprep.subr.mxu0 %v3360_v4 }
 0x11b   :  { %3109 = vmatpush3.msra.mxu0 %v4363_v46  ;;  %v1850_v18 = vand.u32 4294901760, %v1849_v26 }
 0x11c   :  { %3110 = vmatprep.subr.mxu0 %v3360_v4 }
 0x11d   :  { %3111 = vmatpush3.msra.mxu0 %v4365_v47  ;;  %3134 = vmatpush3.msra.mxu1 %v1850_v18 }
 0x11e   :  { %3112 = vmatprep.subr.mxu0 %v3360_v4  ;;  %3135 = vmatprep.subr.mxu1 %v3360_v4 }
 0x11f   :  { %3113 = vmatpush3.msra.mxu0 %v4376_v3  ;;  %3136 = vmatpush3.msra.mxu1 %v1857_v34 }
 0x120   :  { %3114 = vmatprep.subr.mxu0 %v3360_v4  ;;  %3137 = vmatprep.subr.mxu1 %v3360_v4 }
 0x121   :  { %3115 = vmatpush3.msra.mxu0 %v4378_v52 }
 0x122   :  { %3116 = vmatprep.subr.mxu0 %v3360_v4 }
 0x123   :  { %3117 = vmatpush3.msra.mxu0 %v4380_v5 }
 0x124   :  { %3118 = vmatprep.subr.mxu0 %v3360_v4 }
 0x125   :  { %3119 = vmatpush3.msra.mxu0 %v4406_v63 }
 0x126   :  { %3120 = vmatprep.subr.mxu0 %v3360_v4 }
 0x127   :  { %3121 = vmatpush3.msra.mxu0 %v4433_v27 }
 0x128   :  { %3122 = vmatprep.subr.mxu0 %v3360_v4 }
 0x149   :  { %v576_v32 = vpop.f32.mrf.mxu1 }
 0x14b   :  { %v578_v17 = vpop.f32.mrf.mxu1 }
 0x14c   :  { %v1864_v17 = vand.u32 4294901760, %v1863_v7 }
 0x14e   :  { %3138 = vmatpush3.msra.mxu1 %v1864_v17 }
 0x14f   :  { %v583_v1 = vpop.f32.mrf.mxu1  ;;  %3139 = vmatprep.subr.mxu1 %v3360_v4 }
 0x151   :  { %v585_v8 = vpop.f32.mrf.mxu1 }
 0x152   :  { %v4459_v8 = vand.u32 4294901760, %v1729_v0 }
 0x153   :  { %v334_v9 = vpop.f32.mrf.mxu0 }
 0x154   :  { %v335_v10 = vadd.f32 %v4342_v51, %v334_v9 }
 0x155   :  { %v336_v40 = vpop.f32.mrf.mxu0 }
 0x156   :  { %v4345_v14 = vadd.f32 %v576_v32, %v335_v10  ;;  %v1884_v10 = vsub.f32 %v4404_v11, %v1883_v43 }
 0x158   :  { %v349_v15 = vpop.f32.mrf.mxu0 }
 0x159   :  { %v350_v19 = vadd.f32 %v4342_v51, %v349_v15  ;;  %v590_v58 = vpop.f32.mrf.mxu1 }
 0x15a   :  { %v351_v16 = vpop.f32.mrf.mxu0 }
 0x15b   :  { %v592_v20 = vpop.f32.mrf.mxu1  ;;  %v4348_v21 = vadd.f32 %v583_v1, %v350_v19  ;;  %v4457_v1 = vand.u32 4294901760, %v1730_v37  ;;  %v1871_v19 = vand.u32 4294901760, %v1870_v6 }
 0x15c   :  { %v4476_v20 = vsub.f32 %v1729_v0, %v4459_v8 }
 0x15d   :  { %v4471_v16 = vsub.f32 %v1730_v37, %v4457_v1  ;;  %3140 = vmatpush3.msra.mxu1 %v1871_v19  ;;  %3123 = vmatpush3.msra.mxu0 %v4457_v1 }
 0x15e   :  { %v1911_v53 = vand.u32 4294901760, %v4476_v20  ;;  %3141 = vmatprep.subr.mxu1 %v3360_v4  ;;  %3124 = vmatprep.subr.mxu0 %v3360_v4 }
 0x15f   :  { %v1904_v28 = vand.u32 4294901760, %v4471_v16  ;;  %3142 = vmatpush3.msra.mxu1 %v1878_v22  ;;  %3125 = vmatpush3.msra.mxu0 %v4459_v8 }
 0x160   :  { %3143 = vmatprep.subr.mxu1 %v3360_v4  ;;  %v1912_v56 = vsub.f32 %v4476_v20, %v1911_v53  ;;  %3126 = vmatprep.subr.mxu0 %v3360_v4 }
 0x161   :  { %v4359_v29 = vpop.f32.mrf.mxu1 }
 0x162   :  { %v364_v60 = vpop.f32.mrf.mxu0  ;;  %v1913_v18 = vand.u32 4294901760, %v1912_v56 }
 0x163   :  { %v365_v59 = vadd.f32 %v4342_v51, %v364_v60  ;;  %v599_v2 = vpop.f32.mrf.mxu1  ;;  %v1905_v60 = vsub.f32 %v4471_v16, %v1904_v28 }
 0x164   :  { %v366_v61 = vpop.f32.mrf.mxu0 }
 0x165   :  { %v4411_v50 = vadd.f32 %v590_v58, %v365_v59  ;;  %v1897_v58 = vand.u32 4294901760, %v4448_v25  ;;  %v1906_v37 = vand.u32 4294901760, %v1905_v60 }
 0x167   :  { %v1898_v35 = vsub.f32 %v4448_v25, %v1897_v58 }
 0x169   :  { %v1899_v61 = vand.u32 4294901760, %v1898_v35 }
 0x16a   :  { %v379_v49 = vpop.f32.mrf.mxu0 }
 0x16b   :  { %v380_v44 = vadd.f32 %v4342_v51, %v379_v49  ;;  %v604_v32 = vpop.f32.mrf.mxu1 }
 0x16c   :  { %v381_v9 = vpop.f32.mrf.mxu0 }
 0x16d   :  { %v606_v40 = vpop.f32.mrf.mxu1  ;;  %v4467_v15 = vadd.f32 %v4359_v29, %v380_v44  ;;  %v1885_v29 = vand.u32 4294901760, %v1884_v10 }
 0x16f   :  { %3144 = vmatpush3.msra.mxu1 %v1885_v29 }
 0x170   :  { %3145 = vmatprep.subr.mxu1 %v3360_v4 }
 0x171   :  { %3146 = vmatpush3.msra.mxu1 %v1892_v45 }
 0x172   :  { %3147 = vmatprep.subr.mxu1 %v3360_v4 }
 0x173   :  { %3148 = vmatpush3.msra.mxu1 %v1899_v61 }
 0x174   :  { %v394_v24 = vpop.f32.mrf.mxu0  ;;  %3149 = vmatprep.subr.mxu1 %v3360_v4 }
 0x175   :  { %v395_v59 = vadd.f32 %v4342_v51, %v394_v24  ;;  %v611_v2 = vpop.f32.mrf.mxu1  ;;  %3150 = vmatpush3.msra.mxu1 %v1906_v37 }
 0x176   :  { %v396_v26 = vpop.f32.mrf.mxu0  ;;  %3151 = vmatprep.subr.mxu1 %v3360_v4 }
 0x177   :  { %v613_v48 = vpop.f32.mrf.mxu1  ;;  %v605_v7 = vadd.f32 %v604_v32, %v395_v59  ;;  %3152 = vmatpush3.msra.mxu1 %v1913_v18 }
 0x178   :  { %3153 = vmatprep.subr.mxu1 %v3360_v4 }
 0x179   :  { %v863_v0 = vpop.f32.mrf.mxu1 }
 0x17b   :  { %v865_v34 = vpop.f32.mrf.mxu1 }
 0x17f   :  { %v874_v6 = vpop.f32.mrf.mxu1  ;;  %v409_v49 = vpop.f32.mrf.mxu0 }
 0x180   :  { %v410_v39 = vadd.f32 %v4342_v51, %v409_v49 }
 0x181   :  { %v876_v44 = vpop.f32.mrf.mxu1  ;;  %v411_v32 = vpop.f32.mrf.mxu0 }
 0x182   :  { %v612_v17 = vadd.f32 %v611_v2, %v410_v39 }
 0x184   :  { %v885_v9 = vpop.f32.mrf.mxu1 }
 0x186   :  { %v723_v10 = vpop.f32.mrf.mxu0  ;;  %v887_v40 = vpop.f32.mrf.mxu1 }
 0x187   :  { %v724_v19 = vadd.f32 %v723_v10, %v4345_v14 }
 0x188   :  { %v725_v22 = vpop.f32.mrf.mxu0 }
 0x189   :  { %v864_v23 = vadd.f32 %v863_v0, %v724_v19 }
 0x18a   :  { %v896_v29 = vpop.f32.mrf.mxu1 }
 0x18c   :  { %v732_v35 = vpop.f32.mrf.mxu0  ;;  %v898_v45 = vpop.f32.mrf.mxu1 }
 0x18d   :  { %v733_v60 = vadd.f32 %v732_v35, %v4348_v21 }
 0x18e   :  { %v734_v24 = vpop.f32.mrf.mxu0 }
 0x18f   :  { %v875_v59 = vadd.f32 %v874_v6, %v733_v60 }
 0x190   :  { %v907_v61 = vpop.f32.mrf.mxu1 }
 0x192   :  { %v741_v56 = vpop.f32.mrf.mxu0  ;;  %v909_v51 = vpop.f32.mrf.mxu1 }
 0x193   :  { %v742_v26 = vadd.f32 %v741_v56, %v4411_v50 }
 0x194   :  { %v743_v2 = vpop.f32.mrf.mxu0 }
 0x195   :  { %v886_v48 = vadd.f32 %v885_v9, %v742_v26 }
 0x196   :  { %v918_v37 = vpop.f32.mrf.mxu1 }
 0x198   :  { %v750_v18 = vpop.f32.mrf.mxu0  ;;  %v920_v34 = vpop.f32.mrf.mxu1 }
 0x199   :  { %v751_v14 = vadd.f32 %v750_v18, %v4467_v15 }
 0x19a   :  { %v752_v0 = vpop.f32.mrf.mxu0 }
 0x19b   :  { %v897_v49 = vadd.f32 %v896_v29, %v751_v14 }
 0x19d   :  { %v759_v39 = vpop.f32.mrf.mxu0 }
 0x19e   :  { %v760_v44 = vadd.f32 %v759_v39, %v605_v7 }
 0x19f   :  { %v761_v32 = vpop.f32.mrf.mxu0 }
 0x1a0   :  { %v908_v21 = vadd.f32 %v907_v61, %v760_v44 }
 0x1a2   :  { %v768_v10 = vpop.f32.mrf.mxu0 }
 0x1a3   :  { %v769_v6 = vadd.f32 %v768_v10, %v612_v17 }
 0x1a4   :  { %v770_v40 = vpop.f32.mrf.mxu0 }
 0x1a5   :  { %v919_v19 = vadd.f32 %v918_v37, %v769_v6 }
 0x1ac   :  { %v1173_v22 = vpop.f32.mrf.mxu1 }
 0x1ae   :  { %v1175_v35 = vpop.f32.mrf.mxu1 }
 0x1b0   :  { %v1180_v50 = vpop.f32.mrf.mxu1 }
 0x1b2   :  { %v1182_v45 = vpop.f32.mrf.mxu1 }
 0x1b4   :  { %v1187_v9 = vpop.f32.mrf.mxu1  ;;  %v1047_v60 = vpop.f32.mrf.mxu0 }
 0x1b5   :  { %v1048_v24 = vadd.f32 %v1047_v60, %v864_v23 }
 0x1b6   :  { %v1189_v56 = vpop.f32.mrf.mxu1  ;;  %v1049_v51 = vpop.f32.mrf.mxu0 }
 0x1b7   :  { %v1174_v15 = vadd.f32 %v1173_v22, %v1048_v24 }
 0x1b8   :  { %v1194_v26 = vpop.f32.mrf.mxu1  ;;  %v1054_v29 = vpop.f32.mrf.mxu0 }
 0x1b9   :  { %v1055_v2 = vadd.f32 %v1054_v29, %v875_v59  ;;  %v1212_v56 = vmax.f32 %v1174_v15, 0.0 }
 0x1ba   :  { %v1196_v7 = vpop.f32.mrf.mxu1  ;;  %v1056_v18 = vpop.f32.mrf.mxu0 }
 0x1bb   :  { %v1181_v61 = vadd.f32 %v1180_v50, %v1055_v2 }
 0x1bc   :  { %v1201_v34 = vpop.f32.mrf.mxu1  ;;  %v1061_v17 = vpop.f32.mrf.mxu0 }
 0x1bd   :  { %v1062_v14 = vadd.f32 %v1061_v17, %v886_v48  ;;  %v2915_v17 = vld [vmem:[%s4805_s5] ss:$0 sm:$0xff]  ;;  %s3364_s5 = smov 32  }
 0x1be   :  { %v1203_v37 = vpop.f32.mrf.mxu1  ;;  %v1063_v0 = vpop.f32.mrf.mxu0 }
 0x1bf   :  { %v1188_v39 = vadd.f32 %v1187_v9, %v1062_v14  ;;  %v1219_v0 = vsel %vm1218_vm8, %v1212_v56, -inf }
 0x1c0   :  { %v1208_v44 = vpop.f32.mrf.mxu1  ;;  %v1068_v32 = vpop.f32.mrf.mxu0 }
 0x1c1   :  { %v1069_v10 = vadd.f32 %v1068_v32, %v897_v49  ;;  %v1214_v40 = vmax.f32 %v1188_v39, 0.0  ;;  %v1728_v49 = vld [vmem:[%s4804_s6 + $0x8] sm:$0xff] }
 0x1c2   :  { %v1210_v6 = vpop.f32.mrf.mxu1  ;;  %v1070_v23 = vpop.f32.mrf.mxu0 }
 0x1c3   :  { %v1195_v35 = vadd.f32 %v1194_v26, %v1069_v10  ;;  %v1221_v48 = vsel %vm1218_vm8, %v1214_v40, -inf  ;;  %v4520_v26 = vand.u32 4294901760, %v1728_v49 }
 0x1c4   :  { %v1075_v22 = vpop.f32.mrf.mxu0  ;;  %v1409_v45 = vpop.f32.mrf.mxu1 }
 0x1c5   :  { %v1215_v60 = vmax.f32 %v1195_v35, 0.0  ;;  %v1076_v59 = vadd.f32 %v1075_v22, %v908_v21  ;;  %v1727_v21 = vld [vmem:[%s4804_s6] sm:$0xff]  ;;  %v4529_v14 = vsub.f32 %v1728_v49, %v4520_v26  ;;  %3127 = vmatpush3.msra.mxu0 %v4520_v26 }
 0x1c6   :  { %v1077_v24 = vpop.f32.mrf.mxu0  ;;  %v3069_v50 = vpop.f32.mrf.mxu1  ;;  %v4531_v37 = vand.u32 4294901760, %v1727_v21  ;;  %3128 = vmatprep.subr.mxu0 %v3360_v4 }
 0x1c7   :  { %v1222_v51 = vsel %vm1218_vm8, %v1215_v60, -inf  ;;  %v1202_v9 = vadd.f32 %v1201_v34, %v1076_v59  ;;  %v1918_v40 = vand.u32 4294901760, %v4529_v14 }
 0x1c8   :  { %v1228_v29 = vmax.f32 %v1221_v48, %v1222_v51  ;;  %v1082_v2 = vpop.f32.mrf.mxu0  ;;  %v4539_v35 = vsub.f32 %v1727_v21, %v4531_v37  ;;  %3129 = vmatpush3.msra.mxu0 %v4531_v37 }
 0x1c9   :  { %v1216_v7 = vmax.f32 %v1202_v9, 0.0  ;;  %v1083_v18 = vadd.f32 %v1082_v2, %v919_v19  ;;  %v1213_v19 = vmax.f32 %v1181_v61, 0.0  ;;  %3160 = vmatprep.subr.mxu0 %v3360_v4 }
 0x1ca   :  { %v1084_v15 = vpop.f32.mrf.mxu0  ;;  %v1563_v34 = vpop.f32.mrf.mxu1  ;;  %v1925_v59 = vand.u32 4294901760, %v4539_v35 }
 0x1cb   :  { %v1223_v39 = vsel %vm1218_vm8, %v1216_v7, -inf  ;;  %v1209_v32 = vadd.f32 %v1208_v44, %v1083_v18  ;;  %v1919_v44 = vsub.f32 %v4529_v14, %v1918_v40  ;;  %v1220_v24 = vsel %vm1218_vm8, %v1213_v19, -inf }
 0x1cc   :  { %v1224_v10 = vmax.f32 %v1219_v0, %v1223_v39  ;;  %v1323_v6 = vpop.f32.mrf.mxu0  ;;  %v3087_v23 = vpop.f32.mrf.mxu1  ;;  %v1926_v9 = vsub.f32 %v4539_v35, %v1925_v59 }
 0x1cd   :  { %v1217_v22 = vmax.f32 %v1209_v32, 0.0  ;;  %v1324_v60 = vadd.f32 %v2915_v17, %v1323_v6  ;;  %v1920_v51 = vand.u32 4294901760, %v1919_v44 }
 0x1ce   :  { %v3060_v61 = vpop.f32.mrf.mxu0  ;;  %v1927_v18 = vand.u32 4294901760, %v1926_v9 }
 0x1cf   :  { %v1225_v50 = vsel %vm1218_vm8, %v1217_v22, -inf  ;;  %v1410_v56 = vadd.f32 %v1409_v45, %v1324_v60  ;;  %3154 = vmatpush3.msra.mxu1 %v1920_v51 }
 0x1d0   :  { %v1226_v48 = vmax.f32 %v1220_v24, %v1225_v50  ;;  %3155 = vmatprep.subr.mxu1 %v3360_v4 }
 0x1d1   :  { %v1717_v49 = vpop.f32.mrf.mxu1  ;;  %3156 = vmatpush3.msra.mxu1 %v1927_v18 }
 0x1d2   :  { %v1227_v2 = vmax.f32 %v1224_v10, %v1226_v48  ;;  %v1487_v7 = vpop.f32.mrf.mxu0  ;;  %3187 = vmatprep.subr.mxu1 %v3360_v4 }
 0x1d3   :  { %v1488_v21 = vadd.f32 %v1487_v7, %v1410_v56  ;;  %v3105_v15 = vpop.f32.mrf.mxu1 }
 0x1d4   :  { %v3078_v17 = vpop.f32.mrf.mxu0  ;;  %v1229_v0 = vmax.f32 %v1227_v2, %v1228_v29 }
 0x1d5   :  { %v1564_v45 = vadd.f32 %v1563_v34, %v1488_v21 }
 0x1d8   :  { %v1643_v19 = vpop.f32.mrf.mxu0 }
 0x1d9   :  { %v1644_v39 = vadd.f32 %v1643_v19, %v1564_v45  ;;  %v17_v19 = vstv %s4808_s11 }
 0x1da   :  { %v3096_v32 = vpop.f32.mrf.mxu0  ;;  %18 = vst [vmem:[#allocation2] sm:$0x1] %v17_v19 }
 0x1db   :  { %v1718_v6 = vadd.f32 %v1717_v49, %v1644_v39 }
 0x1dd   :  { %v1721_v23 = vmax.f32 %v1718_v6, 0.0 }
 0x1df   :  { %1723 = vrot.lane.b32.xlu0 %v1721_v23, %s3364_s5 }
 0x251   :  { %v1724_v10 = vpop.permute.xlu0 %1723 }
 0x252   :  { %v1726_v22 = vsel %vm1218_vm8, %v1229_v0, %v1724_v10 }
 0x253   :  { %v1748_v60 = vsel %vm1746_vm4, %v1726_v22, 0 }
 0x254   :  { %v4555_v61 = vand.u32 4294901760, %v1748_v60 }
 0x256   :  { %v1828_v29 = vsub.f32 %v1748_v60, %v4555_v61  ;;  %3158 = vmatmul.mubr.f32.vlgmr.msra.gmra.mxu1 %v4555_v61  ;;  %v2917_v60 = vld [vmem:[%s4809_s9] ss:$0 sm:$0xff] }
 0x257   :  { %3188 = vmatpush3.msra.mxu1 %v4361_v33  ;;  %3211 = vmatprep.mubr.msk.f32.mxu1 %vm3363_vm12, %v3360_v4 }
 0x258   :  { %v1829_v34 = vand.u32 4294901760, %v1828_v29  ;;  %3189 = vmatprep.subr.mxu1 %v3360_v4 }
 0x259   :  { %3190 = vmatpush3.msra.mxu1 %v4363_v46 }
 0x25a   :  { %3191 = vmatprep.subr.mxu1 %v3360_v4  ;;  %v1830_v44 = vsub.f32 %v1828_v29, %v1829_v34 }
 0x25b   :  { %3192 = vmatpush3.msra.mxu1 %v4365_v47 }
 0x25c   :  { %3193 = vmatprep.subr.mxu1 %v3360_v4  ;;  %v1831_v24 = vand.u32 4294901760, %v1830_v44 }
 0x25d   :  { %3194 = vmatpush3.msra.mxu1 %v4376_v3 }
 0x25e   :  { %3195 = vmatprep.subr.mxu1 %v3360_v4  ;;  %3131 = vmatmul.mubr.f32.vlgmr.msra.gmra.mxu0 %v1831_v24 }
 0x25f   :  { %3161 = vmatpush3.msra.mxu0 %v4387_v38  ;;  %3196 = vmatpush3.msra.mxu1 %v4378_v52 }
 0x260   :  { %3162 = vmatprep.subr.mxu0 %v3360_v4  ;;  %3197 = vmatprep.subr.mxu1 %v3360_v4 }
 0x261   :  { %3163 = vmatpush3.msra.mxu0 %v4390_v31  ;;  %3198 = vmatpush3.msra.mxu1 %v4380_v5 }
 0x262   :  { %3164 = vmatprep.subr.mxu0 %v3360_v4  ;;  %3199 = vmatprep.subr.mxu1 %v3360_v4 }
 0x263   :  { %3165 = vmatpush3.msra.mxu0 %v4393_v30  ;;  %3200 = vmatpush3.msra.mxu1 %v4406_v63 }
 0x264   :  { %3166 = vmatprep.subr.mxu0 %v3360_v4  ;;  %3201 = vmatprep.subr.mxu1 %v3360_v4 }
 0x265   :  { %3167 = vmatpush3.msra.mxu0 %v4397_v13  ;;  %3202 = vmatpush3.msra.mxu1 %v4433_v27  ;;  %v2340_v13 = vld [vmem:[%s4806_s8] sm:$0xff] }
 0x266   :  { %3168 = vmatprep.subr.mxu0 %v3360_v4  ;;  %3203 = vmatprep.subr.mxu1 %v3360_v4 }
 0x267   :  { %3169 = vmatpush3.msra.mxu0 %v4400_v36  ;;  %3204 = vmatpush3.msra.mxu1 %v4457_v1 }
 0x268   :  { %3170 = vmatprep.subr.mxu0 %v3360_v4  ;;  %3205 = vmatprep.subr.mxu1 %v3360_v4 }
 0x269   :  { %3171 = vmatpush3.msra.mxu0 %v4404_v11  ;;  %3206 = vmatpush3.msra.mxu1 %v4459_v8 }
 0x26a   :  { %3172 = vmatprep.subr.mxu0 %v3360_v4  ;;  %3207 = vmatprep.subr.mxu1 %v3360_v4 }
 0x26b   :  { %3173 = vmatpush3.msra.mxu0 %v4421_v55  ;;  %3208 = vmatpush3.msra.mxu1 %v4520_v26 }
 0x26c   :  { %3174 = vmatprep.subr.mxu0 %v3360_v4  ;;  %3209 = vmatprep.subr.mxu1 %v3360_v4 }
 0x26d   :  { %3175 = vmatpush3.msra.mxu0 %v4448_v25  ;;  %3210 = vmatpush3.msra.mxu1 %v4531_v37 }
 0x26e   :  { %3176 = vmatprep.subr.mxu0 %v3360_v4  ;;  %3212 = vmatmul.mubr.f32.vlgmr.msra.gmra.mxu1 %v1829_v34 }
 0x26f   :  { %3241 = vmatprep.subr.mxu1 %v3360_v4  ;;  %3177 = vmatpush3.msra.mxu0 %v4471_v16 }
 0x270   :  { %3242 = vmatpush3.msra.mxu1 %v4361_v33  ;;  %3178 = vmatprep.subr.mxu0 %v3360_v4  ;;  %v2343_v33 = vld [vmem:[%s4806_s8 + $0x18] sm:$0xff] }
 0x271   :  { %3243 = vmatprep.subr.mxu1 %v3360_v4  ;;  %3179 = vmatpush3.msra.mxu0 %v4476_v20 }
 0x272   :  { %3244 = vmatpush3.msra.mxu1 %v4363_v46  ;;  %3180 = vmatprep.subr.mxu0 %v3360_v4  ;;  %v4684_v46 = vand.u32 4294901760, %v2343_v33 }
 0x273   :  { %3245 = vmatprep.subr.mxu1 %v3360_v4  ;;  %3181 = vmatpush3.msra.mxu0 %v4529_v14 }
 0x274   :  { %3246 = vmatpush3.msra.mxu1 %v4365_v47  ;;  %3182 = vmatprep.subr.mxu0 %v3360_v4  ;;  %v2342_v47 = vld [vmem:[%s4806_s8 + $0x10] sm:$0xff] }
 0x275   :  { %3247 = vmatprep.subr.mxu1 %v3360_v4  ;;  %3183 = vmatpush3.msra.mxu0 %v4539_v35 }
 0x276   :  { %3184 = vmatprep.mubr.msk.f32.mxu0 %vm3363_vm12, %v3360_v4  ;;  %3248 = vmatpush3.msra.mxu1 %v4376_v3  ;;  %v4690_v3 = vsub.f32 %v2343_v33, %v4684_v46 }
 0x277   :  { %3185 = vmatmul.mubr.f32.vlgmr.msra.gmra.mxu0 %v1828_v29  ;;  %3214 = vmatprep.subr.mxu0 %v3360_v4 }
 0x278   :  { %3249 = vmatprep.subr.mxu1 %v3360_v4  ;;  %3215 = vmatpush3.msra.mxu0 %v1848_v57  ;;  %v2460_v38 = vand.u32 4294901760, %v4690_v3  ;;  %v4717_v57 = vand.u32 4294901760, %v2340_v13 }
 0x279   :  { %3250 = vmatpush3.msra.mxu1 %v4378_v52  ;;  %3216 = vmatprep.subr.mxu0 %v3360_v4  ;;  %v4692_v52 = vand.u32 4294901760, %v2342_v47 }
 0x27a   :  { %3251 = vmatprep.subr.mxu1 %v3360_v4  ;;  %3217 = vmatpush3.msra.mxu0 %v1855_v62  ;;  %v2461_v36 = vsub.f32 %v4690_v3, %v2460_v38 }
 0x27b   :  { %3252 = vmatpush3.msra.mxu1 %v4380_v5  ;;  %3218 = vmatprep.subr.mxu0 %v3360_v4  ;;  %v2341_v5 = vld [vmem:[%s4806_s8 + $0x8] sm:$0xff]  ;;  %v4701_v31 = vsub.f32 %v2342_v47, %v4692_v52 }
 0x27c   :  { %3253 = vmatprep.subr.mxu1 %v3360_v4  ;;  %3219 = vmatpush3.msra.mxu0 %v1862_v41  ;;  %v4703_v30 = vand.u32 4294901760, %v2341_v5  ;;  %v2462_v62 = vand.u32 4294901760, %v2461_v36  ;;  %v2919_v36 = vld [vmem:[#allocation2] ss:$0 sm:$0xff] }
 0x27d   :  { %3254 = vmatpush3.msra.mxu1 %v4406_v63  ;;  %3220 = vmatprep.subr.mxu0 %v3360_v4  ;;  %v2467_v11 = vand.u32 4294901760, %v4701_v31 }
 0x27e   :  { %3255 = vmatprep.subr.mxu1 %v3360_v4  ;;  %3221 = vmatpush3.msra.mxu0 %v1869_v12  ;;  %v4715_v63 = vsub.f32 %v2341_v5, %v4703_v30 }
 0x27f   :  { %3256 = vmatpush3.msra.mxu1 %v4433_v27  ;;  %3222 = vmatprep.subr.mxu0 %v3360_v4  ;;  %v2468_v41 = vsub.f32 %v4701_v31, %v2467_v11 }
 0x280   :  { %3257 = vmatprep.subr.mxu1 %v3360_v4  ;;  %3223 = vmatpush3.msra.mxu0 %v1876_v42  ;;  %v2474_v12 = vand.u32 4294901760, %v4715_v63  ;;  %v4726_v42 = vsub.f32 %v2340_v13, %v4717_v57 }
 0x281   :  { %3258 = vmatpush3.msra.mxu1 %v4457_v1  ;;  %3224 = vmatprep.subr.mxu0 %v3360_v4  ;;  %v2469_v55 = vand.u32 4294901760, %v2468_v41 }
 0x282   :  { %3259 = vmatprep.subr.mxu1 %v3360_v4  ;;  %3225 = vmatpush3.msra.mxu0 %v1883_v43  ;;  %v2475_v27 = vsub.f32 %v4715_v63, %v2474_v12  ;;  %v2481_v43 = vand.u32 4294901760, %v4726_v42 }
 0x283   :  { %3260 = vmatpush3.msra.mxu1 %v4459_v8  ;;  %3226 = vmatprep.subr.mxu0 %v3360_v4 }
 0x284   :  { %3261 = vmatprep.subr.mxu1 %v3360_v4  ;;  %3227 = vmatpush3.msra.mxu0 %v1890_v54  ;;  %v2476_v25 = vand.u32 4294901760, %v2475_v27  ;;  %v2482_v54 = vsub.f32 %v4726_v42, %v2481_v43 }
 0x285   :  { %3262 = vmatpush3.msra.mxu1 %v4520_v26  ;;  %3228 = vmatprep.subr.mxu0 %v3360_v4 }
 0x286   :  { %3263 = vmatprep.subr.mxu1 %v3360_v4  ;;  %3229 = vmatpush3.msra.mxu0 %v1897_v58  ;;  %v2483_v1 = vand.u32 4294901760, %v2482_v54 }
 0x287   :  { %3264 = vmatpush3.msra.mxu1 %v4531_v37  ;;  %3265 = vmatprep.mubr.msk.f32.mxu1 %vm3363_vm12, %v3360_v4  ;;  %v2916_v37 = vld [vmem:[%s4807_s7] ss:$0 sm:$0xff] }
 0x288   :  { %3230 = vmatprep.subr.mxu0 %v3360_v4  ;;  %3266 = vmatmul.mubr.f32.vlgmr.msra.gmra.mxu1 %v4555_v61 }
 0x289   :  { %3231 = vmatpush3.msra.mxu0 %v1904_v28  ;;  %3238 = vmatprep.mubr.msk.f32.mxu0 %vm3363_vm12, %v3360_v4 }
 0x28a   :  { %3232 = vmatprep.subr.mxu0 %v3360_v4  ;;  %3279 = vmatprep.subr.mxu1 %v3360_v4 }
 0x28b   :  { %3233 = vmatpush3.msra.mxu0 %v1911_v53  ;;  %3287 = vmatprep.mubr.msk.f32.mxu1 %vm3363_vm12, %v3360_v4 }
 0x28c   :  { %3234 = vmatprep.subr.mxu0 %v3360_v4  ;;  %3280 = vmatpush3.msra.mxu1 %v2462_v62 }
 0x28d   :  { %3235 = vmatpush3.msra.mxu0 %v1918_v40  ;;  %3281 = vmatprep.subr.mxu1 %v3360_v4 }
 0x28e   :  { %3236 = vmatprep.subr.mxu0 %v3360_v4  ;;  %3282 = vmatpush3.msra.mxu1 %v2469_v55 }
 0x28f   :  { %3237 = vmatpush3.msra.mxu0 %v1925_v59  ;;  %3283 = vmatprep.subr.mxu1 %v3360_v4 }
 0x290   :  { %3239 = vmatmul.mubr.f32.vlgmr.msra.gmra.mxu0 %v4555_v61  ;;  %3268 = vmatprep.subr.mxu0 %v3360_v4 }
 0x291   :  { %3276 = vmatprep.mubr.msk.f32.mxu0 %vm3363_vm12, %v3360_v4  ;;  %3269 = vmatpush3.msra.mxu0 %v4684_v46 }
 0x292   :  { %3270 = vmatprep.subr.mxu0 %v3360_v4  ;;  %3284 = vmatpush3.msra.mxu1 %v2476_v25 }
 0x293   :  { %3271 = vmatpush3.msra.mxu0 %v4692_v52  ;;  %3285 = vmatprep.subr.mxu1 %v3360_v4 }
 0x294   :  { %3272 = vmatprep.subr.mxu0 %v3360_v4  ;;  %3286 = vmatpush3.msra.mxu1 %v2483_v1 }
 0x295   :  { %3273 = vmatpush3.msra.mxu0 %v4703_v30  ;;  %3301 = vmatprep.subr.mxu1 %v3360_v4 }
 0x296   :  { %3274 = vmatprep.subr.mxu0 %v3360_v4 }
 0x297   :  { %3275 = vmatpush3.msra.mxu0 %v4717_v57 }
 0x298   :  { %3290 = vmatprep.subr.mxu0 %v3360_v4 }
 0x316   :  { %v1964_v8 = vpop.f32.mrf.mxu1 }
 0x318   :  { %v3159_v58 = vpop.f32.mrf.mxu1 }
 0x31e   :  { %v1833_v16 = vpop.f32.mrf.mxu0 }
 0x31f   :  { %v1834_v40 = vadd.f32 %v2916_v37, %v1833_v16 }
 0x320   :  { %v3132_v20 = vpop.f32.mrf.mxu0 }
 0x321   :  { %v1965_v59 = vadd.f32 %v1964_v8, %v1834_v40 }
 0x32e   :  { %v2145_v28 = vpop.f32.mrf.mxu1 }
 0x330   :  { %v3213_v53 = vpop.f32.mrf.mxu1 }
 0x337   :  { %v2060_v26 = vpop.f32.mrf.mxu0 }
 0x338   :  { %v2061_v56 = vadd.f32 %v2060_v26, %v1965_v59 }
 0x339   :  { %v3186_v14 = vpop.f32.mrf.mxu0 }
 0x33a   :  { %v2146_v48 = vadd.f32 %v2145_v28, %v2061_v56 }
 0x348   :  { %v2335_v35 = vpop.f32.mrf.mxu1 }
 0x34a   :  { %v3267_v50 = vpop.f32.mrf.mxu1 }
 0x350   :  { %v2252_v51 = vpop.f32.mrf.mxu0 }
 0x351   :  { %v2253_v9 = vadd.f32 %v2252_v51, %v2146_v48 }
 0x352   :  { %v3240_v49 = vpop.f32.mrf.mxu0 }
 0x353   :  { %v2336_v2 = vadd.f32 %v2335_v35, %v2253_v9 }
 0x355   :  { %v2339_v7 = vmax.f32 %v2336_v2, 0.0 }
 0x357   :  { %v2352_v18 = vsel %vm1218_vm8, %v2339_v7, 0 }
 0x358   :  { %v2423_v21 = vand.u32 4294901760, %v2352_v18 }
 0x35a   :  { %v2424_v15 = vsub.f32 %v2352_v18, %v2423_v21  ;;  %3288 = vmatmul.mubr.f32.vlgmr.msra.gmra.mxu1 %v2423_v21 }
 0x35b   :  { %3302 = vmatpush3.msra.mxu1 %v4684_v46  ;;  %3309 = vmatprep.mubr.msk.f32.mxu1 %vm3363_vm12, %v3360_v4 }
 0x35c   :  { %3303 = vmatprep.subr.mxu1 %v3360_v4  ;;  %v2425_v17 = vand.u32 4294901760, %v2424_v15 }
 0x35d   :  { %3304 = vmatpush3.msra.mxu1 %v4692_v52 }
 0x35e   :  { %3305 = vmatprep.subr.mxu1 %v3360_v4  ;;  %v2426_v0 = vsub.f32 %v2424_v15, %v2425_v17 }
 0x35f   :  { %3306 = vmatpush3.msra.mxu1 %v4703_v30 }
 0x360   :  { %3307 = vmatprep.subr.mxu1 %v3360_v4  ;;  %v2427_v45 = vand.u32 4294901760, %v2426_v0 }
 0x361   :  { %3308 = vmatpush3.msra.mxu1 %v4717_v57 }
 0x362   :  { %3310 = vmatmul.mubr.f32.vlgmr.msra.gmra.mxu1 %v2425_v17  ;;  %3323 = vmatprep.subr.mxu1 %v3360_v4 }
 0x363   :  { %3277 = vmatmul.mubr.f32.vlgmr.msra.gmra.mxu0 %v2427_v45  ;;  %3324 = vmatpush3.msra.mxu1 %v4684_v46 }
 0x364   :  { %3291 = vmatpush3.msra.mxu0 %v4690_v3  ;;  %3325 = vmatprep.subr.mxu1 %v3360_v4 }
 0x365   :  { %3292 = vmatprep.subr.mxu0 %v3360_v4  ;;  %3326 = vmatpush3.msra.mxu1 %v4692_v52 }
 0x366   :  { %3293 = vmatpush3.msra.mxu0 %v4701_v31  ;;  %3327 = vmatprep.subr.mxu1 %v3360_v4 }
 0x367   :  { %3294 = vmatprep.subr.mxu0 %v3360_v4  ;;  %3328 = vmatpush3.msra.mxu1 %v4703_v30 }
 0x368   :  { %3295 = vmatpush3.msra.mxu0 %v4715_v63  ;;  %3329 = vmatprep.subr.mxu1 %v3360_v4 }
 0x369   :  { %3296 = vmatprep.subr.mxu0 %v3360_v4  ;;  %3298 = vmatprep.mubr.msk.f32.mxu0 %vm3363_vm12, %v3360_v4 }
 0x36a   :  { %3297 = vmatpush3.msra.mxu0 %v4726_v42  ;;  %3330 = vmatpush3.msra.mxu1 %v4717_v57 }
 0x36b   :  { %3331 = vmatprep.mubr.msk.f32.mxu1 %vm3363_vm12, %v3360_v4  ;;  %3299 = vmatmul.mubr.f32.vlgmr.msra.gmra.mxu0 %v2424_v15 }
 0x36c   :  { %3312 = vmatprep.subr.mxu0 %v3360_v4  ;;  %3332 = vmatmul.mubr.f32.vlgmr.msra.gmra.mxu1 %v2423_v21 }
 0x36d   :  { %3313 = vmatpush3.msra.mxu0 %v2460_v38  ;;  %3320 = vmatprep.mubr.msk.f32.mxu0 %vm3363_vm12, %v3360_v4  ;;  %v2918_v38 = vld [vmem:[%s4810_s10] ss:$0 sm:$0xff] }
 0x36e   :  { %3314 = vmatprep.subr.mxu0 %v3360_v4 }
 0x36f   :  { %3315 = vmatpush3.msra.mxu0 %v2467_v11 }
 0x370   :  { %3316 = vmatprep.subr.mxu0 %v3360_v4 }
 0x371   :  { %3317 = vmatpush3.msra.mxu0 %v2474_v12 }
 0x372   :  { %3318 = vmatprep.subr.mxu0 %v3360_v4 }
 0x373   :  { %3319 = vmatpush3.msra.mxu0 %v2481_v43 }
 0x374   :  { %3321 = vmatmul.mubr.f32.vlgmr.msra.gmra.mxu0 %v2423_v21 }
 0x41a   :  { %v2520_v39 = vpop.f32.mrf.mxu1 }
 0x41c   :  { %v3289_v32 = vpop.f32.mrf.mxu1 }
 0x422   :  { %v2677_v6 = vpop.f32.mrf.mxu1 }
 0x423   :  { %v2429_v23 = vpop.f32.mrf.mxu0 }
 0x424   :  { %v3311_v10 = vpop.f32.mrf.mxu1  ;;  %v2430_v4 = vadd.f32 %v2917_v60, %v2429_v23 }
 0x425   :  { %v3278_v22 = vpop.f32.mrf.mxu0 }
 0x426   :  { %v2521_v34 = vadd.f32 %v2520_v39, %v2430_v4 }
 0x42b   :  { %v2600_v61 = vpop.f32.mrf.mxu0 }
 0x42c   :  { %v2835_v29 = vpop.f32.mrf.mxu1  ;;  %v2601_v33 = vadd.f32 %v2600_v61, %v2521_v34 }
 0x42d   :  { %v3300_v44 = vpop.f32.mrf.mxu0 }
 0x42e   :  { %v3333_v24 = vpop.f32.mrf.mxu1  ;;  %v2678_v46 = vadd.f32 %v2677_v6, %v2601_v33 }
 0x434   :  { %v2760_v47 = vpop.f32.mrf.mxu0 }
 0x435   :  { %v2761_v3 = vadd.f32 %v2760_v47, %v2678_v46 }
 0x436   :  { %v3322_v52 = vpop.f32.mrf.mxu0 }
 0x437   :  { %v2836_v5 = vadd.f32 %v2835_v29, %v2761_v3 }
 0x439   :  { %v2839_v31 = vmax.f32 %v2836_v5, 0.0 }
 0x43b   :  { %v2847_v30 = vmul.f32 %v2918_v38, %v2839_v31 }
 0x43d   :  { %v2849_v13 = vsel %vm2848_vm0, %v2847_v30, 0.0 }
 0x43e   :  { %2850 = vadd.xlane.f32.xlu1 %v2849_v13 }
 0x4c7   :  { %v2851_v11 = vpop.xlane.xlu1 %2850 }
 0x4c8   :  { %v2859_v63 = vadd.f32 %v2919_v36, %v2851_v11 }
 0x4ca   :  { %2861 = vst.msk [vmem:[%s4811_s12] sm:$0xff] %vm2860_vm13, %v2859_v63 }

</bundles_post_ra>
